<compile_context>
chip_gen: v7x
topology: tpu7x:2x2x1
jax: 0.10.0
libtpu: 0.0.40
codegen_flags: <defaults>
</compile_context>

<pallas_src>
import functools

import numpy as np
import jax
import jax.numpy as jnp
from jax import lax
from jax.experimental import pallas as pl
from jax.experimental.pallas import tpu as pltpu


def _lstm_classifier_kernel(x_ref, len_ref, w_ih_ref, w_hh_ref, b_ref,
                            w_out_ref, b_out_ref, out_ref, xproj_scr,
                            *, T, B, E, HP, unroll):
    """x_ref: (T,B,E) bf16.  len_ref: (B,1) i32.  w_ih_ref: (E,4*HP) bf16.
    w_hh_ref: (HP,4*HP) bf16.  b_ref: (1,4*HP) f32.  w_out_ref: (HP,1) f32.
    b_out_ref: (1,1) f32.  out_ref: (B,1) f32.  xproj_scr: VMEM (T,B,4*HP) bf16.
    Gate k lives in lanes [k*HP, k*HP + H); padding lanes have zero weights/bias."""
    # --- One-shot fused input projection for all timesteps (MXU, bias folded in). ---
    x_all = x_ref[...].reshape(T * B, E)                                    # bf16
    xproj = jnp.dot(x_all, w_ih_ref[...], preferred_element_type=jnp.float32)
    xproj_scr[...] = (xproj + b_ref[...]).astype(jnp.bfloat16).reshape(T, B, 4 * HP)

    w_hh = w_hh_ref[...]                                                    # bf16 (HP, 4*HP)
    len_vec = len_ref[...]                                                  # (B, 1) i32

    def step(t, carry):
        h, c = carry                                                        # f32 (B, HP)
        gates = (xproj_scr[t].astype(jnp.float32)
                 + jnp.dot(h.astype(jnp.bfloat16), w_hh,
                           preferred_element_type=jnp.float32))             # (B, 4*HP)
        # Each slice below is a vreg-aligned full 128-lane window (HP = 128).
        i_g = jax.nn.sigmoid(gates[:, 0 * HP:1 * HP])
        f_g = jax.nn.sigmoid(gates[:, 1 * HP:2 * HP])
        g_g = jnp.tanh(gates[:, 2 * HP:3 * HP])
        o_g = jax.nn.sigmoid(gates[:, 3 * HP:4 * HP])
        c_new = f_g * c + i_g * g_g
        h_new = o_g * jnp.tanh(c_new)
        valid = t < len_vec                                                 # (B, 1) bool
        # Freeze state past each sequence's length so h after the loop == h_{len-1}.
        return jnp.where(valid, h_new, h), jnp.where(valid, c_new, c)

    h0 = jnp.zeros((B, HP), jnp.float32)
    c0 = jnp.zeros((B, HP), jnp.float32)
    h_last, _ = lax.fori_loop(0, T, step, (h0, c0), unroll=unroll)

    # --- hidden2out + sigmoid(0.2 * logit), applied once per batch tile. ---
    logit = (jnp.dot(h_last, w_out_ref[...], preferred_element_type=jnp.float32)
             + b_out_ref[...])                                              # (B, 1)
    out_ref[...] = jax.nn.sigmoid(logit * jnp.float32(0.2))


def lstm_classifier_forward(x, lengths, w_ih, w_hh, b, w_out, b_out):
    """x: (T, B, E) f32 time-major padded batch; lengths: (B,) i32 valid lengths.
    w_ih: (4, E, H), w_hh: (4, H, H), b: (4, 1, H) = b_ih + b_hh (gate order i,f,g,o),
    w_out: (H, 1), b_out: (1, 1).  Returns (B, 1) f32 = sigmoid(0.2 * Linear(h_{len-1}))."""
    T, B, E = x.shape
    H = w_hh.shape[-1]
    HP = max(128, ((H + 127) // 128) * 128)          # lane-pad each gate block to full vregs
    B_TILE = 256 if B >= 256 else ((B + 7) // 8) * 8  # >=8 (f32 sublanes); big tiles shard on v7x
    n_tiles = -(-B // B_TILE)
    B_pad = n_tiles * B_TILE

    # Fused, lane-padded weights: gate k occupies columns [k*HP, k*HP + H).
    w_ih_cat = jnp.zeros((E, 4 * HP), jnp.float32)
    w_hh_cat = jnp.zeros((HP, 4 * HP), jnp.float32)
    b_cat = jnp.zeros((1, 4 * HP), jnp.float32)
    for k in range(4):
        w_ih_cat = w_ih_cat.at[:, k * HP:k * HP + H].set(w_ih[k])
        w_hh_cat = w_hh_cat.at[:H, k * HP:k * HP + H].set(w_hh[k])
        b_cat = b_cat.at[:, k * HP:k * HP + H].set(b[k].reshape(1, H))
    w_ih_cat = w_ih_cat.astype(jnp.bfloat16)
    w_hh_cat = w_hh_cat.astype(jnp.bfloat16)
    w_out_pad = jnp.zeros((HP, 1), jnp.float32).at[:H].set(w_out.astype(jnp.float32))

    lengths = jnp.clip(jnp.reshape(lengths, (-1,)).astype(jnp.int32), 1, T)   # guard 0/>T
    x_p = jnp.zeros((T, B_pad, E), jnp.float32).at[:, :B].set(x).astype(jnp.bfloat16)
    len_p = jnp.ones((B_pad, 1), jnp.int32).at[:B, 0].set(lengths)

    unroll = True if T <= 8 else 4
    kernel = functools.partial(_lstm_classifier_kernel,
                               T=T, B=B_TILE, E=E, HP=HP, unroll=unroll)

    # Explicit scoped-VMEM budget (defaults: 16 MiB v5e / 32 MiB v6e,v7x are too small
    # for moderate T*B).  Double-buffer the BlockSpec'd operands, single xproj scratch.
    bytes_needed = (
        2 * T * B_TILE * E * 2                     # x block (bf16), double-buffered
        + T * B_TILE * 4 * HP * 2                  # xproj scratch (bf16)
        + 2 * (E * 4 * HP * 2 + HP * 4 * HP * 2    # fused weights (bf16)
               + 4 * HP * 4 + HP * 4 + 4           # biases + hidden2out (f32)
               + B_TILE * 4 + B_TILE * 4)          # lengths + out
        + (4 << 20))                               # headroom for temporaries
    vmem_limit = int(min(max(bytes_needed, 32 << 20), 64 << 20))

    grid_spec = pltpu.PrefetchScalarGridSpec(
        num_scalar_prefetch=0,
        grid=(n_tiles,),
        in_specs=[
            pl.BlockSpec((T, B_TILE, E), lambda bt: (0, bt, 0)),      # x (bf16)
            pl.BlockSpec((B_TILE, 1), lambda bt: (bt, 0)),            # lengths (i32)
            pl.BlockSpec((E, 4 * HP), lambda bt: (0, 0)),             # W_ih fused (bf16)
            pl.BlockSpec((HP, 4 * HP), lambda bt: (0, 0)),            # W_hh fused (bf16)
            pl.BlockSpec((1, 4 * HP), lambda bt: (0, 0)),             # bias fused (f32)
            pl.BlockSpec((HP, 1), lambda bt: (0, 0)),                 # hidden2out W
            pl.BlockSpec((1, 1), lambda bt: (0, 0)),                  # hidden2out b
        ],
        out_specs=pl.BlockSpec((B_TILE, 1), lambda bt: (bt, 0)),
        scratch_shapes=[
            pltpu.VMEM((T, B_TILE, 4 * HP), jnp.bfloat16),            # hoisted x-projection
        ],
    )

    out = pl.pallas_call(
        kernel,
        out_shape=jax.ShapeDtypeStruct((B_pad, 1), jnp.float32),
        grid_spec=grid_spec,
        compiler_params=pltpu.CompilerParams(
            dimension_semantics=("parallel",),     # batch tiles -> TensorCores on v7x
            vmem_limit_bytes=vmem_limit),
    )(x_p, len_p, w_ih_cat, w_hh_cat, b_cat, w_out_pad, b_out.astype(jnp.float32))
    return out[:B]


def lstm_classifier_ref(x, lengths, w_ih, w_hh, b, w_out, b_out):
    """Pure-JAX f32 reference matching the PyTorch module's semantics."""
    T, B, E = x.shape
    H = w_hh.shape[-1]

    def step(carry, x_t):
        h, c = carry
        i = jax.nn.sigmoid(x_t @ w_ih[0] + h @ w_hh[0] + b[0])
        f = jax.nn.sigmoid(x_t @ w_ih[1] + h @ w_hh[1] + b[1])
        g = jnp.tanh(x_t @ w_ih[2] + h @ w_hh[2] + b[2])
        o = jax.nn.sigmoid(x_t @ w_ih[3] + h @ w_hh[3] + b[3])
        c = f * c + i * g
        h = o * jnp.tanh(c)
        return (h, c), h

    (_, _), hs = lax.scan(step, (jnp.zeros((B, H)), jnp.zeros((B, H))), x)
    logits = hs @ w_out + b_out                              # (T, B, 1)
    last = logits[jnp.reshape(lengths, (-1,)) - 1, jnp.arange(B), :]   # (B, 1)
    return jax.nn.sigmoid(last * 0.2)


if __name__ == "__main__":
    # Small shapes consistent with the module: seq=8, batch=4, embed=32, hidden=32.
    T, B, E, H = 8, 4, 32, 32

    key = jax.random.PRNGKey(0)
    kx, k1, k2, k3, k4, k5, k6 = jax.random.split(key, 7)

    # PyTorch nn.LSTM default init: U(-1/sqrt(H), 1/sqrt(H)); gate order [i, f, g, o].
    bound = 1.0 / np.sqrt(H)
    w_ih = jax.random.uniform(k1, (4, E, H), jnp.float32, -bound, bound)
    w_hh = jax.random.uniform(k2, (4, H, H), jnp.float32, -bound, bound)
    b_ih = jax.random.uniform(k3, (4, 1, H), jnp.float32, -bound, bound)
    b_hh = jax.random.uniform(k4, (4, 1, H), jnp.float32, -bound, bound)
    b = b_ih + b_hh
    w_out = jax.random.uniform(k5, (H, 1), jnp.float32, -bound, bound)
    b_out = jax.random.uniform(k6, (1, 1), jnp.float32, -bound, bound)

    # Padded time-major input + per-sequence valid lengths (packed-sequence stand-in).
    x = jax.random.normal(kx, (T, B, E), jnp.float32)
    lengths = jnp.array([3, 8, 5, 1], dtype=jnp.int32)       # (B,)

    out = lstm_classifier_forward(x, lengths, w_ih, w_hh, b, w_out, b_out)
    out = jax.block_until_ready(out)

    ref = lstm_classifier_ref(x, lengths, w_ih, w_hh, b, w_out, b_out)
    # bf16 MXU operands + bf16 xproj scratch -> slightly looser tolerance than pure-f32.
    np.testing.assert_allclose(np.asarray(out), np.asarray(ref), rtol=2e-2, atol=1e-2)

    print("KERNEL_OK")
</pallas_src>

<mosaic_0001>
module attributes {stable_mosaic.version = 11 : i64} {
  func.func @_lstm_classifier_kernel(%arg0: i32, %arg1: memref<8x8x32xbf16, #tpu.memory_space<vmem>>, %arg2: memref<8x1xi32, #tpu.memory_space<vmem>>, %arg3: memref<32x512xbf16, #tpu.memory_space<vmem>>, %arg4: memref<128x512xbf16, #tpu.memory_space<vmem>>, %arg5: memref<1x512xf32, #tpu.memory_space<vmem>>, %arg6: memref<128x1xf32, #tpu.memory_space<vmem>>, %arg7: memref<1x1xf32, #tpu.memory_space<vmem>>, %arg8: memref<8x1xf32, #tpu.memory_space<vmem>>, %arg9: memref<8x8x512xbf16, #tpu.memory_space<vmem>>) attributes {dimension_semantics = [#tpu.dimension_semantics<parallel>], iteration_bounds = array<i64: 1>, scalar_prefetch = 0 : i64, scratch_operands = 1 : i64, tpu.core_type = #tpu.core_type<tc>, window_params = [{transform_indices = @transform_0, window_bounds = array<i64: 8, 8, 32>}, {transform_indices = @transform_1, window_bounds = array<i64: 8, 1>}, {pipeline_mode = #tpu.pipeline_mode<synchronous>, transform_indices = @transform_2, window_bounds = array<i64: 32, 512>}, {pipeline_mode = #tpu.pipeline_mode<synchronous>, transform_indices = @transform_3, window_bounds = array<i64: 128, 512>}, {pipeline_mode = #tpu.pipeline_mode<synchronous>, transform_indices = @transform_4, window_bounds = array<i64: 1, 512>}, {pipeline_mode = #tpu.pipeline_mode<synchronous>, transform_indices = @transform_5, window_bounds = array<i64: 128, 1>}, {pipeline_mode = #tpu.pipeline_mode<synchronous>, transform_indices = @transform_6, window_bounds = array<i64: 1, 1>}, {transform_indices = @transform_7, window_bounds = array<i64: 8, 1>}]} {
    %c0 = arith.constant 0 : index
    %c0_0 = arith.constant 0 : index
    %c0_1 = arith.constant 0 : index
    %0 = vector.load %arg1[%c0, %c0_0, %c0_1] : memref<8x8x32xbf16, #tpu.memory_space<vmem>>, vector<8x8x32xbf16>
    %1 = vector.shape_cast %0 : vector<8x8x32xbf16> to vector<64x32xbf16>
    %c0_2 = arith.constant 0 : index
    %c0_3 = arith.constant 0 : index
    %2 = vector.load %arg3[%c0_2, %c0_3] : memref<32x512xbf16, #tpu.memory_space<vmem>>, vector<32x512xbf16>
    %cst = arith.constant dense<0.000000e+00> : vector<64x512xf32>
    %3 = tpu.matmul %1, %2, %cst {dimension_numbers = #tpu.dot_dimension_numbers<[1], [0], [0], [1], [0, 0, 1, 1], [], []>} : vector<64x32xbf16>, vector<32x512xbf16>, vector<64x512xf32> -> vector<64x512xf32>
    %c0_4 = arith.constant 0 : index
    %c0_5 = arith.constant 0 : index
    %4 = vector.load %arg5[%c0_4, %c0_5] : memref<1x512xf32, #tpu.memory_space<vmem>>, vector<1x512xf32>
    %5 = vector.broadcast %4 : vector<1x512xf32> to vector<64x512xf32>
    %6 = arith.addf %3, %5 : vector<64x512xf32>
    %7 = arith.truncf %6 : vector<64x512xf32> to vector<64x512xbf16>
    %8 = vector.shape_cast %7 : vector<64x512xbf16> to vector<8x8x512xbf16>
    %c0_6 = arith.constant 0 : index
    %c0_7 = arith.constant 0 : index
    %c0_8 = arith.constant 0 : index
    %9 = vector.load %arg9[%c0_6, %c0_7, %c0_8] : memref<8x8x512xbf16, #tpu.memory_space<vmem>>, vector<8x8x512xbf16>
    tpu.vector_store %arg9[%c0_6, %c0_7, %c0_8], %8 {strides = array<i32>} : memref<8x8x512xbf16, #tpu.memory_space<vmem>>, vector<8x8x512xbf16>,
    %c0_9 = arith.constant 0 : index
    %c0_10 = arith.constant 0 : index
    %10 = vector.load %arg4[%c0_9, %c0_10] : memref<128x512xbf16, #tpu.memory_space<vmem>>, vector<128x512xbf16>
    %c0_11 = arith.constant 0 : index
    %c0_12 = arith.constant 0 : index
    %11 = vector.load %arg2[%c0_11, %c0_12] : memref<8x1xi32, #tpu.memory_space<vmem>>, vector<8x1xi32>
    %cst_13 = arith.constant 0.000000e+00 : f32
    %12 = vector.broadcast %cst_13 : f32 to vector<8x128xf32>
    %cst_14 = arith.constant 0.000000e+00 : f32
    %13 = vector.broadcast %cst_14 : f32 to vector<8x128xf32>
    %c0_i32 = arith.constant 0 : i32
    %14 = arith.index_cast %c0_i32 : i32 to index
    %c0_15 = arith.constant 0 : index
    %c0_16 = arith.constant 0 : index
    %15 = vector.load %arg9[%14, %c0_15, %c0_16] : memref<8x8x512xbf16, #tpu.memory_space<vmem>>, vector<1x8x512xbf16>
    %16 = vector.shape_cast %15 : vector<1x8x512xbf16> to vector<8x512xbf16>
    %17 = arith.extf %16 : vector<8x512xbf16> to vector<8x512xf32>
    %18 = arith.truncf %12 : vector<8x128xf32> to vector<8x128xbf16>
    %cst_17 = arith.constant dense<0.000000e+00> : vector<8x512xf32>
    %19 = tpu.matmul %18, %10, %cst_17 {dimension_numbers = #tpu.dot_dimension_numbers<[1], [0], [0], [1], [0, 0, 1, 1], [], []>} : vector<8x128xbf16>, vector<128x512xbf16>, vector<8x512xf32> -> vector<8x512xf32>
    %20 = arith.addf %17, %19 : vector<8x512xf32>
    %21 = vector.extract_strided_slice %20 {offsets = [0, 0], sizes = [8, 128], strides = [1, 1]} : vector<8x512xf32> to vector<8x128xf32>
    %22 = arith.negf %21 : vector<8x128xf32>
    %23 = math.exp %22 : vector<8x128xf32>
    %cst_18 = arith.constant 1.000000e+00 : f32
    %24 = vector.broadcast %cst_18 : f32 to vector<8x128xf32>
    %25 = arith.addf %24, %23 : vector<8x128xf32>
    %26 = arith.divf %24, %25 : vector<8x128xf32>
    %27 = vector.extract_strided_slice %20 {offsets = [0, 128], sizes = [8, 128], strides = [1, 1]} : vector<8x512xf32> to vector<8x128xf32>
    %28 = arith.negf %27 : vector<8x128xf32>
    %29 = math.exp %28 : vector<8x128xf32>
    %cst_19 = arith.constant 1.000000e+00 : f32
    %30 = vector.broadcast %cst_19 : f32 to vector<8x128xf32>
    %31 = arith.addf %30, %29 : vector<8x128xf32>
    %32 = arith.divf %30, %31 : vector<8x128xf32>
    %33 = vector.extract_strided_slice %20 {offsets = [0, 256], sizes = [8, 128], strides = [1, 1]} : vector<8x512xf32> to vector<8x128xf32>
    %34 = math.tanh %33 : vector<8x128xf32>
    %35 = vector.extract_strided_slice %20 {offsets = [0, 384], sizes = [8, 128], strides = [1, 1]} : vector<8x512xf32> to vector<8x128xf32>
    %36 = arith.negf %35 : vector<8x128xf32>
    %37 = math.exp %36 : vector<8x128xf32>
    %cst_20 = arith.constant 1.000000e+00 : f32
    %38 = vector.broadcast %cst_20 : f32 to vector<8x128xf32>
    %39 = arith.addf %38, %37 : vector<8x128xf32>
    %40 = arith.divf %38, %39 : vector<8x128xf32>
    %41 = arith.mulf %32, %13 : vector<8x128xf32>
    %42 = arith.mulf %26, %34 : vector<8x128xf32>
    %43 = arith.addf %41, %42 : vector<8x128xf32>
    %44 = math.tanh %43 : vector<8x128xf32>
    %45 = arith.mulf %40, %44 : vector<8x128xf32>
    %46 = vector.broadcast %c0_i32 : i32 to vector<8x1xi32>
    %47 = arith.cmpi slt, %46, %11 : vector<8x1xi32>
    %48 = vector.shape_cast %47 : vector<8x1xi1> to vector<8x1xi1>
    %49 = vector.broadcast %48 : vector<8x1xi1> to vector<8x128xi1>
    %50 = arith.select %49, %45, %12 : vector<8x128xi1>, vector<8x128xf32>
    %51 = vector.shape_cast %47 : vector<8x1xi1> to vector<8x1xi1>
    %52 = vector.broadcast %51 : vector<8x1xi1> to vector<8x128xi1>
    %53 = arith.select %52, %43, %13 : vector<8x128xi1>, vector<8x128xf32>
    %c1_i32 = arith.constant 1 : i32
    %54 = arith.index_cast %c1_i32 : i32 to index
    %c0_21 = arith.constant 0 : index
    %c0_22 = arith.constant 0 : index
    %55 = vector.load %arg9[%54, %c0_21, %c0_22] : memref<8x8x512xbf16, #tpu.memory_space<vmem>>, vector<1x8x512xbf16>
    %56 = vector.shape_cast %55 : vector<1x8x512xbf16> to vector<8x512xbf16>
    %57 = arith.extf %56 : vector<8x512xbf16> to vector<8x512xf32>
    %58 = arith.truncf %50 : vector<8x128xf32> to vector<8x128xbf16>
    %cst_23 = arith.constant dense<0.000000e+00> : vector<8x512xf32>
    %59 = tpu.matmul %58, %10, %cst_23 {dimension_numbers = #tpu.dot_dimension_numbers<[1], [0], [0], [1], [0, 0, 1, 1], [], []>} : vector<8x128xbf16>, vector<128x512xbf16>, vector<8x512xf32> -> vector<8x512xf32>
    %60 = arith.addf %57, %59 : vector<8x512xf32>
    %61 = vector.extract_strided_slice %60 {offsets = [0, 0], sizes = [8, 128], strides = [1, 1]} : vector<8x512xf32> to vector<8x128xf32>
    %62 = arith.negf %61 : vector<8x128xf32>
    %63 = math.exp %62 : vector<8x128xf32>
    %cst_24 = arith.constant 1.000000e+00 : f32
    %64 = vector.broadcast %cst_24 : f32 to vector<8x128xf32>
    %65 = arith.addf %64, %63 : vector<8x128xf32>
    %66 = arith.divf %64, %65 : vector<8x128xf32>
    %67 = vector.extract_strided_slice %60 {offsets = [0, 128], sizes = [8, 128], strides = [1, 1]} : vector<8x512xf32> to vector<8x128xf32>
    %68 = arith.negf %67 : vector<8x128xf32>
    %69 = math.exp %68 : vector<8x128xf32>
    %cst_25 = arith.constant 1.000000e+00 : f32
    %70 = vector.broadcast %cst_25 : f32 to vector<8x128xf32>
    %71 = arith.addf %70, %69 : vector<8x128xf32>
    %72 = arith.divf %70, %71 : vector<8x128xf32>
    %73 = vector.extract_strided_slice %60 {offsets = [0, 256], sizes = [8, 128], strides = [1, 1]} : vector<8x512xf32> to vector<8x128xf32>
    %74 = math.tanh %73 : vector<8x128xf32>
    %75 = vector.extract_strided_slice %60 {offsets = [0, 384], sizes = [8, 128], strides = [1, 1]} : vector<8x512xf32> to vector<8x128xf32>
    %76 = arith.negf %75 : vector<8x128xf32>
    %77 = math.exp %76 : vector<8x128xf32>
    %cst_26 = arith.constant 1.000000e+00 : f32
    %78 = vector.broadcast %cst_26 : f32 to vector<8x128xf32>
    %79 = arith.addf %78, %77 : vector<8x128xf32>
    %80 = arith.divf %78, %79 : vector<8x128xf32>
    %81 = arith.mulf %72, %53 : vector<8x128xf32>
    %82 = arith.mulf %66, %74 : vector<8x128xf32>
    %83 = arith.addf %81, %82 : vector<8x128xf32>
    %84 = math.tanh %83 : vector<8x128xf32>
    %85 = arith.mulf %80, %84 : vector<8x128xf32>
    %86 = vector.broadcast %c1_i32 : i32 to vector<8x1xi32>
    %87 = arith.cmpi slt, %86, %11 : vector<8x1xi32>
    %88 = vector.shape_cast %87 : vector<8x1xi1> to vector<8x1xi1>
    %89 = vector.broadcast %88 : vector<8x1xi1> to vector<8x128xi1>
    %90 = arith.select %89, %85, %50 : vector<8x128xi1>, vector<8x128xf32>
    %91 = vector.shape_cast %87 : vector<8x1xi1> to vector<8x1xi1>
    %92 = vector.broadcast %91 : vector<8x1xi1> to vector<8x128xi1>
    %93 = arith.select %92, %83, %53 : vector<8x128xi1>, vector<8x128xf32>
    %c2_i32 = arith.constant 2 : i32
    %94 = arith.index_cast %c2_i32 : i32 to index
    %c0_27 = arith.constant 0 : index
    %c0_28 = arith.constant 0 : index
    %95 = vector.load %arg9[%94, %c0_27, %c0_28] : memref<8x8x512xbf16, #tpu.memory_space<vmem>>, vector<1x8x512xbf16>
    %96 = vector.shape_cast %95 : vector<1x8x512xbf16> to vector<8x512xbf16>
    %97 = arith.extf %96 : vector<8x512xbf16> to vector<8x512xf32>
    %98 = arith.truncf %90 : vector<8x128xf32> to vector<8x128xbf16>
    %cst_29 = arith.constant dense<0.000000e+00> : vector<8x512xf32>
    %99 = tpu.matmul %98, %10, %cst_29 {dimension_numbers = #tpu.dot_dimension_numbers<[1], [0], [0], [1], [0, 0, 1, 1], [], []>} : vector<8x128xbf16>, vector<128x512xbf16>, vector<8x512xf32> -> vector<8x512xf32>
    %100 = arith.addf %97, %99 : vector<8x512xf32>
    %101 = vector.extract_strided_slice %100 {offsets = [0, 0], sizes = [8, 128], strides = [1, 1]} : vector<8x512xf32> to vector<8x128xf32>
    %102 = arith.negf %101 : vector<8x128xf32>
    %103 = math.exp %102 : vector<8x128xf32>
    %cst_30 = arith.constant 1.000000e+00 : f32
    %104 = vector.broadcast %cst_30 : f32 to vector<8x128xf32>
    %105 = arith.addf %104, %103 : vector<8x128xf32>
    %106 = arith.divf %104, %105 : vector<8x128xf32>
    %107 = vector.extract_strided_slice %100 {offsets = [0, 128], sizes = [8, 128], strides = [1, 1]} : vector<8x512xf32> to vector<8x128xf32>
    %108 = arith.negf %107 : vector<8x128xf32>
    %109 = math.exp %108 : vector<8x128xf32>
    %cst_31 = arith.constant 1.000000e+00 : f32
    %110 = vector.broadcast %cst_31 : f32 to vector<8x128xf32>
    %111 = arith.addf %110, %109 : vector<8x128xf32>
    %112 = arith.divf %110, %111 : vector<8x128xf32>
    %113 = vector.extract_strided_slice %100 {offsets = [0, 256], sizes = [8, 128], strides = [1, 1]} : vector<8x512xf32> to vector<8x128xf32>
    %114 = math.tanh %113 : vector<8x128xf32>
    %115 = vector.extract_strided_slice %100 {offsets = [0, 384], sizes = [8, 128], strides = [1, 1]} : vector<8x512xf32> to vector<8x128xf32>
    %116 = arith.negf %115 : vector<8x128xf32>
    %117 = math.exp %116 : vector<8x128xf32>
    %cst_32 = arith.constant 1.000000e+00 : f32
    %118 = vector.broadcast %cst_32 : f32 to vector<8x128xf32>
    %119 = arith.addf %118, %117 : vector<8x128xf32>
    %120 = arith.divf %118, %119 : vector<8x128xf32>
    %121 = arith.mulf %112, %93 : vector<8x128xf32>
    %122 = arith.mulf %106, %114 : vector<8x128xf32>
    %123 = arith.addf %121, %122 : vector<8x128xf32>
    %124 = math.tanh %123 : vector<8x128xf32>
    %125 = arith.mulf %120, %124 : vector<8x128xf32>
    %126 = vector.broadcast %c2_i32 : i32 to vector<8x1xi32>
    %127 = arith.cmpi slt, %126, %11 : vector<8x1xi32>
    %128 = vector.shape_cast %127 : vector<8x1xi1> to vector<8x1xi1>
    %129 = vector.broadcast %128 : vector<8x1xi1> to vector<8x128xi1>
    %130 = arith.select %129, %125, %90 : vector<8x128xi1>, vector<8x128xf32>
    %131 = vector.shape_cast %127 : vector<8x1xi1> to vector<8x1xi1>
    %132 = vector.broadcast %131 : vector<8x1xi1> to vector<8x128xi1>
    %133 = arith.select %132, %123, %93 : vector<8x128xi1>, vector<8x128xf32>
    %c3_i32 = arith.constant 3 : i32
    %134 = arith.index_cast %c3_i32 : i32 to index
    %c0_33 = arith.constant 0 : index
    %c0_34 = arith.constant 0 : index
    %135 = vector.load %arg9[%134, %c0_33, %c0_34] : memref<8x8x512xbf16, #tpu.memory_space<vmem>>, vector<1x8x512xbf16>
    %136 = vector.shape_cast %135 : vector<1x8x512xbf16> to vector<8x512xbf16>
    %137 = arith.extf %136 : vector<8x512xbf16> to vector<8x512xf32>
    %138 = arith.truncf %130 : vector<8x128xf32> to vector<8x128xbf16>
    %cst_35 = arith.constant dense<0.000000e+00> : vector<8x512xf32>
    %139 = tpu.matmul %138, %10, %cst_35 {dimension_numbers = #tpu.dot_dimension_numbers<[1], [0], [0], [1], [0, 0, 1, 1], [], []>} : vector<8x128xbf16>, vector<128x512xbf16>, vector<8x512xf32> -> vector<8x512xf32>
    %140 = arith.addf %137, %139 : vector<8x512xf32>
    %141 = vector.extract_strided_slice %140 {offsets = [0, 0], sizes = [8, 128], strides = [1, 1]} : vector<8x512xf32> to vector<8x128xf32>
    %142 = arith.negf %141 : vector<8x128xf32>
    %143 = math.exp %142 : vector<8x128xf32>
    %cst_36 = arith.constant 1.000000e+00 : f32
    %144 = vector.broadcast %cst_36 : f32 to vector<8x128xf32>
    %145 = arith.addf %144, %143 : vector<8x128xf32>
    %146 = arith.divf %144, %145 : vector<8x128xf32>
    %147 = vector.extract_strided_slice %140 {offsets = [0, 128], sizes = [8, 128], strides = [1, 1]} : vector<8x512xf32> to vector<8x128xf32>
    %148 = arith.negf %147 : vector<8x128xf32>
    %149 = math.exp %148 : vector<8x128xf32>
    %cst_37 = arith.constant 1.000000e+00 : f32
    %150 = vector.broadcast %cst_37 : f32 to vector<8x128xf32>
    %151 = arith.addf %150, %149 : vector<8x128xf32>
    %152 = arith.divf %150, %151 : vector<8x128xf32>
    %153 = vector.extract_strided_slice %140 {offsets = [0, 256], sizes = [8, 128], strides = [1, 1]} : vector<8x512xf32> to vector<8x128xf32>
    %154 = math.tanh %153 : vector<8x128xf32>
    %155 = vector.extract_strided_slice %140 {offsets = [0, 384], sizes = [8, 128], strides = [1, 1]} : vector<8x512xf32> to vector<8x128xf32>
    %156 = arith.negf %155 : vector<8x128xf32>
    %157 = math.exp %156 : vector<8x128xf32>
    %cst_38 = arith.constant 1.000000e+00 : f32
    %158 = vector.broadcast %cst_38 : f32 to vector<8x128xf32>
    %159 = arith.addf %158, %157 : vector<8x128xf32>
    %160 = arith.divf %158, %159 : vector<8x128xf32>
    %161 = arith.mulf %152, %133 : vector<8x128xf32>
    %162 = arith.mulf %146, %154 : vector<8x128xf32>
    %163 = arith.addf %161, %162 : vector<8x128xf32>
    %164 = math.tanh %163 : vector<8x128xf32>
    %165 = arith.mulf %160, %164 : vector<8x128xf32>
    %166 = vector.broadcast %c3_i32 : i32 to vector<8x1xi32>
    %167 = arith.cmpi slt, %166, %11 : vector<8x1xi32>
    %168 = vector.shape_cast %167 : vector<8x1xi1> to vector<8x1xi1>
    %169 = vector.broadcast %168 : vector<8x1xi1> to vector<8x128xi1>
    %170 = arith.select %169, %165, %130 : vector<8x128xi1>, vector<8x128xf32>
    %171 = vector.shape_cast %167 : vector<8x1xi1> to vector<8x1xi1>
    %172 = vector.broadcast %171 : vector<8x1xi1> to vector<8x128xi1>
    %173 = arith.select %172, %163, %133 : vector<8x128xi1>, vector<8x128xf32>
    %c4_i32 = arith.constant 4 : i32
    %174 = arith.index_cast %c4_i32 : i32 to index
    %c0_39 = arith.constant 0 : index
    %c0_40 = arith.constant 0 : index
    %175 = vector.load %arg9[%174, %c0_39, %c0_40] : memref<8x8x512xbf16, #tpu.memory_space<vmem>>, vector<1x8x512xbf16>
    %176 = vector.shape_cast %175 : vector<1x8x512xbf16> to vector<8x512xbf16>
    %177 = arith.extf %176 : vector<8x512xbf16> to vector<8x512xf32>
    %178 = arith.truncf %170 : vector<8x128xf32> to vector<8x128xbf16>
    %cst_41 = arith.constant dense<0.000000e+00> : vector<8x512xf32>
    %179 = tpu.matmul %178, %10, %cst_41 {dimension_numbers = #tpu.dot_dimension_numbers<[1], [0], [0], [1], [0, 0, 1, 1], [], []>} : vector<8x128xbf16>, vector<128x512xbf16>, vector<8x512xf32> -> vector<8x512xf32>
    %180 = arith.addf %177, %179 : vector<8x512xf32>
    %181 = vector.extract_strided_slice %180 {offsets = [0, 0], sizes = [8, 128], strides = [1, 1]} : vector<8x512xf32> to vector<8x128xf32>
    %182 = arith.negf %181 : vector<8x128xf32>
    %183 = math.exp %182 : vector<8x128xf32>
    %cst_42 = arith.constant 1.000000e+00 : f32
    %184 = vector.broadcast %cst_42 : f32 to vector<8x128xf32>
    %185 = arith.addf %184, %183 : vector<8x128xf32>
    %186 = arith.divf %184, %185 : vector<8x128xf32>
    %187 = vector.extract_strided_slice %180 {offsets = [0, 128], sizes = [8, 128], strides = [1, 1]} : vector<8x512xf32> to vector<8x128xf32>
    %188 = arith.negf %187 : vector<8x128xf32>
    %189 = math.exp %188 : vector<8x128xf32>
    %cst_43 = arith.constant 1.000000e+00 : f32
    %190 = vector.broadcast %cst_43 : f32 to vector<8x128xf32>
    %191 = arith.addf %190, %189 : vector<8x128xf32>
    %192 = arith.divf %190, %191 : vector<8x128xf32>
    %193 = vector.extract_strided_slice %180 {offsets = [0, 256], sizes = [8, 128], strides = [1, 1]} : vector<8x512xf32> to vector<8x128xf32>
    %194 = math.tanh %193 : vector<8x128xf32>
    %195 = vector.extract_strided_slice %180 {offsets = [0, 384], sizes = [8, 128], strides = [1, 1]} : vector<8x512xf32> to vector<8x128xf32>
    %196 = arith.negf %195 : vector<8x128xf32>
    %197 = math.exp %196 : vector<8x128xf32>
    %cst_44 = arith.constant 1.000000e+00 : f32
    %198 = vector.broadcast %cst_44 : f32 to vector<8x128xf32>
    %199 = arith.addf %198, %197 : vector<8x128xf32>
    %200 = arith.divf %198, %199 : vector<8x128xf32>
    %201 = arith.mulf %192, %173 : vector<8x128xf32>
    %202 = arith.mulf %186, %194 : vector<8x128xf32>
    %203 = arith.addf %201, %202 : vector<8x128xf32>
    %204 = math.tanh %203 : vector<8x128xf32>
    %205 = arith.mulf %200, %204 : vector<8x128xf32>
    %206 = vector.broadcast %c4_i32 : i32 to vector<8x1xi32>
    %207 = arith.cmpi slt, %206, %11 : vector<8x1xi32>
    %208 = vector.shape_cast %207 : vector<8x1xi1> to vector<8x1xi1>
    %209 = vector.broadcast %208 : vector<8x1xi1> to vector<8x128xi1>
    %210 = arith.select %209, %205, %170 : vector<8x128xi1>, vector<8x128xf32>
    %211 = vector.shape_cast %207 : vector<8x1xi1> to vector<8x1xi1>
    %212 = vector.broadcast %211 : vector<8x1xi1> to vector<8x128xi1>
    %213 = arith.select %212, %203, %173 : vector<8x128xi1>, vector<8x128xf32>
    %c5_i32 = arith.constant 5 : i32
    %214 = arith.index_cast %c5_i32 : i32 to index
    %c0_45 = arith.constant 0 : index
    %c0_46 = arith.constant 0 : index
    %215 = vector.load %arg9[%214, %c0_45, %c0_46] : memref<8x8x512xbf16, #tpu.memory_space<vmem>>, vector<1x8x512xbf16>
    %216 = vector.shape_cast %215 : vector<1x8x512xbf16> to vector<8x512xbf16>
    %217 = arith.extf %216 : vector<8x512xbf16> to vector<8x512xf32>
    %218 = arith.truncf %210 : vector<8x128xf32> to vector<8x128xbf16>
    %cst_47 = arith.constant dense<0.000000e+00> : vector<8x512xf32>
    %219 = tpu.matmul %218, %10, %cst_47 {dimension_numbers = #tpu.dot_dimension_numbers<[1], [0], [0], [1], [0, 0, 1, 1], [], []>} : vector<8x128xbf16>, vector<128x512xbf16>, vector<8x512xf32> -> vector<8x512xf32>
    %220 = arith.addf %217, %219 : vector<8x512xf32>
    %221 = vector.extract_strided_slice %220 {offsets = [0, 0], sizes = [8, 128], strides = [1, 1]} : vector<8x512xf32> to vector<8x128xf32>
    %222 = arith.negf %221 : vector<8x128xf32>
    %223 = math.exp %222 : vector<8x128xf32>
    %cst_48 = arith.constant 1.000000e+00 : f32
    %224 = vector.broadcast %cst_48 : f32 to vector<8x128xf32>
    %225 = arith.addf %224, %223 : vector<8x128xf32>
    %226 = arith.divf %224, %225 : vector<8x128xf32>
    %227 = vector.extract_strided_slice %220 {offsets = [0, 128], sizes = [8, 128], strides = [1, 1]} : vector<8x512xf32> to vector<8x128xf32>
    %228 = arith.negf %227 : vector<8x128xf32>
    %229 = math.exp %228 : vector<8x128xf32>
    %cst_49 = arith.constant 1.000000e+00 : f32
    %230 = vector.broadcast %cst_49 : f32 to vector<8x128xf32>
    %231 = arith.addf %230, %229 : vector<8x128xf32>
    %232 = arith.divf %230, %231 : vector<8x128xf32>
    %233 = vector.extract_strided_slice %220 {offsets = [0, 256], sizes = [8, 128], strides = [1, 1]} : vector<8x512xf32> to vector<8x128xf32>
    %234 = math.tanh %233 : vector<8x128xf32>
    %235 = vector.extract_strided_slice %220 {offsets = [0, 384], sizes = [8, 128], strides = [1, 1]} : vector<8x512xf32> to vector<8x128xf32>
    %236 = arith.negf %235 : vector<8x128xf32>
    %237 = math.exp %236 : vector<8x128xf32>
    %cst_50 = arith.constant 1.000000e+00 : f32
    %238 = vector.broadcast %cst_50 : f32 to vector<8x128xf32>
    %239 = arith.addf %238, %237 : vector<8x128xf32>
    %240 = arith.divf %238, %239 : vector<8x128xf32>
    %241 = arith.mulf %232, %213 : vector<8x128xf32>
    %242 = arith.mulf %226, %234 : vector<8x128xf32>
    %243 = arith.addf %241, %242 : vector<8x128xf32>
    %244 = math.tanh %243 : vector<8x128xf32>
    %245 = arith.mulf %240, %244 : vector<8x128xf32>
    %246 = vector.broadcast %c5_i32 : i32 to vector<8x1xi32>
    %247 = arith.cmpi slt, %246, %11 : vector<8x1xi32>
    %248 = vector.shape_cast %247 : vector<8x1xi1> to vector<8x1xi1>
    %249 = vector.broadcast %248 : vector<8x1xi1> to vector<8x128xi1>
    %250 = arith.select %249, %245, %210 : vector<8x128xi1>, vector<8x128xf32>
    %251 = vector.shape_cast %247 : vector<8x1xi1> to vector<8x1xi1>
    %252 = vector.broadcast %251 : vector<8x1xi1> to vector<8x128xi1>
    %253 = arith.select %252, %243, %213 : vector<8x128xi1>, vector<8x128xf32>
    %c6_i32 = arith.constant 6 : i32
    %254 = arith.index_cast %c6_i32 : i32 to index
    %c0_51 = arith.constant 0 : index
    %c0_52 = arith.constant 0 : index
    %255 = vector.load %arg9[%254, %c0_51, %c0_52] : memref<8x8x512xbf16, #tpu.memory_space<vmem>>, vector<1x8x512xbf16>
    %256 = vector.shape_cast %255 : vector<1x8x512xbf16> to vector<8x512xbf16>
    %257 = arith.extf %256 : vector<8x512xbf16> to vector<8x512xf32>
    %258 = arith.truncf %250 : vector<8x128xf32> to vector<8x128xbf16>
    %cst_53 = arith.constant dense<0.000000e+00> : vector<8x512xf32>
    %259 = tpu.matmul %258, %10, %cst_53 {dimension_numbers = #tpu.dot_dimension_numbers<[1], [0], [0], [1], [0, 0, 1, 1], [], []>} : vector<8x128xbf16>, vector<128x512xbf16>, vector<8x512xf32> -> vector<8x512xf32>
    %260 = arith.addf %257, %259 : vector<8x512xf32>
    %261 = vector.extract_strided_slice %260 {offsets = [0, 0], sizes = [8, 128], strides = [1, 1]} : vector<8x512xf32> to vector<8x128xf32>
    %262 = arith.negf %261 : vector<8x128xf32>
    %263 = math.exp %262 : vector<8x128xf32>
    %cst_54 = arith.constant 1.000000e+00 : f32
    %264 = vector.broadcast %cst_54 : f32 to vector<8x128xf32>
    %265 = arith.addf %264, %263 : vector<8x128xf32>
    %266 = arith.divf %264, %265 : vector<8x128xf32>
    %267 = vector.extract_strided_slice %260 {offsets = [0, 128], sizes = [8, 128], strides = [1, 1]} : vector<8x512xf32> to vector<8x128xf32>
    %268 = arith.negf %267 : vector<8x128xf32>
    %269 = math.exp %268 : vector<8x128xf32>
    %cst_55 = arith.constant 1.000000e+00 : f32
    %270 = vector.broadcast %cst_55 : f32 to vector<8x128xf32>
    %271 = arith.addf %270, %269 : vector<8x128xf32>
    %272 = arith.divf %270, %271 : vector<8x128xf32>
    %273 = vector.extract_strided_slice %260 {offsets = [0, 256], sizes = [8, 128], strides = [1, 1]} : vector<8x512xf32> to vector<8x128xf32>
    %274 = math.tanh %273 : vector<8x128xf32>
    %275 = vector.extract_strided_slice %260 {offsets = [0, 384], sizes = [8, 128], strides = [1, 1]} : vector<8x512xf32> to vector<8x128xf32>
    %276 = arith.negf %275 : vector<8x128xf32>
    %277 = math.exp %276 : vector<8x128xf32>
    %cst_56 = arith.constant 1.000000e+00 : f32
    %278 = vector.broadcast %cst_56 : f32 to vector<8x128xf32>
    %279 = arith.addf %278, %277 : vector<8x128xf32>
    %280 = arith.divf %278, %279 : vector<8x128xf32>
    %281 = arith.mulf %272, %253 : vector<8x128xf32>
    %282 = arith.mulf %266, %274 : vector<8x128xf32>
    %283 = arith.addf %281, %282 : vector<8x128xf32>
    %284 = math.tanh %283 : vector<8x128xf32>
    %285 = arith.mulf %280, %284 : vector<8x128xf32>
    %286 = vector.broadcast %c6_i32 : i32 to vector<8x1xi32>
    %287 = arith.cmpi slt, %286, %11 : vector<8x1xi32>
    %288 = vector.shape_cast %287 : vector<8x1xi1> to vector<8x1xi1>
    %289 = vector.broadcast %288 : vector<8x1xi1> to vector<8x128xi1>
    %290 = arith.select %289, %285, %250 : vector<8x128xi1>, vector<8x128xf32>
    %291 = vector.shape_cast %287 : vector<8x1xi1> to vector<8x1xi1>
    %292 = vector.broadcast %291 : vector<8x1xi1> to vector<8x128xi1>
    %293 = arith.select %292, %283, %253 : vector<8x128xi1>, vector<8x128xf32>
    %c7_i32 = arith.constant 7 : i32
    %294 = arith.index_cast %c7_i32 : i32 to index
    %c0_57 = arith.constant 0 : index
    %c0_58 = arith.constant 0 : index
    %295 = vector.load %arg9[%294, %c0_57, %c0_58] : memref<8x8x512xbf16, #tpu.memory_space<vmem>>, vector<1x8x512xbf16>
    %296 = vector.shape_cast %295 : vector<1x8x512xbf16> to vector<8x512xbf16>
    %297 = arith.extf %296 : vector<8x512xbf16> to vector<8x512xf32>
    %298 = arith.truncf %290 : vector<8x128xf32> to vector<8x128xbf16>
    %cst_59 = arith.constant dense<0.000000e+00> : vector<8x512xf32>
    %299 = tpu.matmul %298, %10, %cst_59 {dimension_numbers = #tpu.dot_dimension_numbers<[1], [0], [0], [1], [0, 0, 1, 1], [], []>} : vector<8x128xbf16>, vector<128x512xbf16>, vector<8x512xf32> -> vector<8x512xf32>
    %300 = arith.addf %297, %299 : vector<8x512xf32>
    %301 = vector.extract_strided_slice %300 {offsets = [0, 0], sizes = [8, 128], strides = [1, 1]} : vector<8x512xf32> to vector<8x128xf32>
    %302 = arith.negf %301 : vector<8x128xf32>
    %303 = math.exp %302 : vector<8x128xf32>
    %cst_60 = arith.constant 1.000000e+00 : f32
    %304 = vector.broadcast %cst_60 : f32 to vector<8x128xf32>
    %305 = arith.addf %304, %303 : vector<8x128xf32>
    %306 = arith.divf %304, %305 : vector<8x128xf32>
    %307 = vector.extract_strided_slice %300 {offsets = [0, 128], sizes = [8, 128], strides = [1, 1]} : vector<8x512xf32> to vector<8x128xf32>
    %308 = arith.negf %307 : vector<8x128xf32>
    %309 = math.exp %308 : vector<8x128xf32>
    %cst_61 = arith.constant 1.000000e+00 : f32
    %310 = vector.broadcast %cst_61 : f32 to vector<8x128xf32>
    %311 = arith.addf %310, %309 : vector<8x128xf32>
    %312 = arith.divf %310, %311 : vector<8x128xf32>
    %313 = vector.extract_strided_slice %300 {offsets = [0, 256], sizes = [8, 128], strides = [1, 1]} : vector<8x512xf32> to vector<8x128xf32>
    %314 = math.tanh %313 : vector<8x128xf32>
    %315 = vector.extract_strided_slice %300 {offsets = [0, 384], sizes = [8, 128], strides = [1, 1]} : vector<8x512xf32> to vector<8x128xf32>
    %316 = arith.negf %315 : vector<8x128xf32>
    %317 = math.exp %316 : vector<8x128xf32>
    %cst_62 = arith.constant 1.000000e+00 : f32
    %318 = vector.broadcast %cst_62 : f32 to vector<8x128xf32>
    %319 = arith.addf %318, %317 : vector<8x128xf32>
    %320 = arith.divf %318, %319 : vector<8x128xf32>
    %321 = arith.mulf %312, %293 : vector<8x128xf32>
    %322 = arith.mulf %306, %314 : vector<8x128xf32>
    %323 = arith.addf %321, %322 : vector<8x128xf32>
    %324 = math.tanh %323 : vector<8x128xf32>
    %325 = arith.mulf %320, %324 : vector<8x128xf32>
    %326 = vector.broadcast %c7_i32 : i32 to vector<8x1xi32>
    %327 = arith.cmpi slt, %326, %11 : vector<8x1xi32>
    %328 = vector.shape_cast %327 : vector<8x1xi1> to vector<8x1xi1>
    %329 = vector.broadcast %328 : vector<8x1xi1> to vector<8x128xi1>
    %330 = arith.select %329, %325, %290 : vector<8x128xi1>, vector<8x128xf32>
    %331 = vector.shape_cast %327 : vector<8x1xi1> to vector<8x1xi1>
    %332 = vector.broadcast %331 : vector<8x1xi1> to vector<8x128xi1>
    %333 = arith.select %332, %323, %293 : vector<8x128xi1>, vector<8x128xf32>
    %c8_i32 = arith.constant 8 : i32
    %c0_63 = arith.constant 0 : index
    %c0_64 = arith.constant 0 : index
    %334 = vector.load %arg6[%c0_63, %c0_64] : memref<128x1xf32, #tpu.memory_space<vmem>>, vector<128x1xf32>
    %cst_65 = arith.constant dense<0.000000e+00> : vector<8x1xf32>
    %335 = tpu.matmul %330, %334, %cst_65 {dimension_numbers = #tpu.dot_dimension_numbers<[1], [0], [0], [1], [0, 0, 1, 1], [], []>} : vector<8x128xf32>, vector<128x1xf32>, vector<8x1xf32> -> vector<8x1xf32>
    %c0_66 = arith.constant 0 : index
    %c0_67 = arith.constant 0 : index
    %336 = vector.load %arg7[%c0_66, %c0_67] : memref<1x1xf32, #tpu.memory_space<vmem>>, vector<1x1xf32>
    %337 = vector.broadcast %336 : vector<1x1xf32> to vector<8x1xf32>
    %338 = arith.addf %335, %337 : vector<8x1xf32>
    %cst_68 = arith.constant 2.000000e-01 : f32
    %339 = vector.broadcast %cst_68 : f32 to vector<8x1xf32>
    %340 = arith.mulf %338, %339 : vector<8x1xf32>
    %341 = arith.negf %340 : vector<8x1xf32>
    %342 = math.exp %341 : vector<8x1xf32>
    %cst_69 = arith.constant 1.000000e+00 : f32
    %343 = vector.broadcast %cst_69 : f32 to vector<8x1xf32>
    %344 = arith.addf %343, %342 : vector<8x1xf32>
    %345 = arith.divf %343, %344 : vector<8x1xf32>
    %c0_70 = arith.constant 0 : index
    %c0_71 = arith.constant 0 : index
    %346 = vector.load %arg8[%c0_70, %c0_71] : memref<8x1xf32, #tpu.memory_space<vmem>>, vector<8x1xf32>
    tpu.vector_store %arg8[%c0_70, %c0_71], %345 {strides = array<i32>} : memref<8x1xf32, #tpu.memory_space<vmem>>, vector<8x1xf32>,
    return
  }
  func.func @transform_0(%arg0: i32) -> (i32, i32, i32) {
    %c0_i32 = arith.constant 0 : i32
    %c0_i32_0 = arith.constant 0 : i32
    %c0_i32_1 = arith.constant 0 : i32
    return %c0_i32, %arg0, %c0_i32_0 : i32, i32, i32
  }
  func.func @transform_1(%arg0: i32) -> (i32, i32) {
    %c0_i32 = arith.constant 0 : i32
    %c0_i32_0 = arith.constant 0 : i32
    return %arg0, %c0_i32 : i32, i32
  }
  func.func @transform_2(%arg0: i32) -> (i32, i32) {
    %c0_i32 = arith.constant 0 : i32
    %c0_i32_0 = arith.constant 0 : i32
    %c0_i32_1 = arith.constant 0 : i32
    return %c0_i32, %c0_i32_0 : i32, i32
  }
  func.func @transform_3(%arg0: i32) -> (i32, i32) {
    %c0_i32 = arith.constant 0 : i32
    %c0_i32_0 = arith.constant 0 : i32
    %c0_i32_1 = arith.constant 0 : i32
    return %c0_i32, %c0_i32_0 : i32, i32
  }
  func.func @transform_4(%arg0: i32) -> (i32, i32) {
    %c0_i32 = arith.constant 0 : i32
    %c0_i32_0 = arith.constant 0 : i32
    %c0_i32_1 = arith.constant 0 : i32
    return %c0_i32, %c0_i32_0 : i32, i32
  }
  func.func @transform_5(%arg0: i32) -> (i32, i32) {
    %c0_i32 = arith.constant 0 : i32
    %c0_i32_0 = arith.constant 0 : i32
    %c0_i32_1 = arith.constant 0 : i32
    return %c0_i32, %c0_i32_0 : i32, i32
  }
  func.func @transform_6(%arg0: i32) -> (i32, i32) {
    %c0_i32 = arith.constant 0 : i32
    %c0_i32_0 = arith.constant 0 : i32
    %c0_i32_1 = arith.constant 0 : i32
    return %c0_i32, %c0_i32_0 : i32, i32
  }
  func.func @transform_7(%arg0: i32) -> (i32, i32) {
    %c0_i32 = arith.constant 0 : i32
    %c0_i32_0 = arith.constant 0 : i32
    return %arg0, %c0_i32 : i32, i32
  }
}

</mosaic_0001>

<bundles_post_ra>
// kernel: tpu_custom_call.1
= control target key start
LH: loop header
LB: loop body
LE: loop exit
PB: predicated region body
PF: predicated region fallthrough
CT: control target
= control target key end

     0   :  { %s2939_s0 = inlined_call_operand.vmem [shape: bf16[8,8,32], index: 0, kind: input, shape index: {}]   ;;  %s2940_s1 = inlined_call_operand.vmem [shape: s32[8,1], index: 1, kind: input, shape index: {}]   ;;  %s2941_s2 = inlined_call_operand.vmem [shape: bf16[32,512], index: 2, kind: input, shape index: {}]   ;;  %s2942_s3 = inlined_call_operand.hbm [shape: bf16[128,512], index: 3, kind: input, shape index: {}]   ;;  %s2943_s4 = inlined_call_operand.vmem [shape: f32[1,512], index: 4, kind: input, shape index: {}]   ;;  %s2944_s5 = inlined_call_operand.vmem [shape: f32[128,1], index: 5, kind: input, shape index: {}]   ;;  %s2945_s6 = inlined_call_operand.<no memory space> [shape: f32[1,1], index: 6, kind: input, shape index: {}]   ;;  %s2946_s7 = inlined_call_operand.vmem [shape: f32[8,1], index: 7, kind: output, shape index: {}]  }
   0x1   :  { %v12_v0 = vstv %s2945_s6 }
   0x2   :  { %13 = vst [vmem:[#allocation3] sm:$0x1] %v12_v0 }
   0x3   :  { %14 = vsyncpa [#allocation5], 0  ;;  %s2170_s26 = smov [#allocation4]   ;;  %s2146_s30 = scalar_lea.hbm %s2942_s3, 4096 }
   0x4   :  { %s26_s27 = sshll.u32 %s2170_s26, 4  ;;  %p2147_p0 = scmp.ne.s32.totalorder %s2942_s3, %s2146_s30  ;;  %s27_s27 = int_to_ptr.vmem [resolvable:$true] %s26_s27 }
   0x5   :  { %p2150_p1 = scmp.lt.u32.totalorder %s2146_s30, %s2942_s3 }
   0x7   :  { %p2152_p2 = pnand %p2150_p1, %p2147_p0 }
   0x9   :  { %2155 = shalt.err (!%p2152_p2)
}
   0xa   :  { %s2156_s6 = scalar_lea.vmem %s27_s27, 4096  ;;  %p2161_p4 = scmp.lt.s32.totalorder %s27_s27, %s27_s27 }
   0xb   :  { %p2157_p3 = scmp.ne.s32.totalorder %s27_s27, %s2156_s6  ;;  %p2162_p5 = scmp.lt.s32.totalorder %s2156_s6, %s2156_s6 }
   0xd   :  { %p2163_p6 = por %p2162_p5, %p2161_p4 }
   0xf   :  { %p2164_p7 = pnand %p2163_p6, %p2157_p3 }
  0x11   :  { %2167 = shalt.err (!%p2164_p7)
}
  0x12   :  { %s2171_s12 = smov 256   ;;  %s2172_s13 = smov 16  }
  0x13   :  { %32 = dma.hbm_to_vmem [thread:$0]  %s2942_s3, 4096, %s27_s27, [#allocation5], %s2171_s12, %s2171_s12, %s2172_s13  }
  0x14   :  { %2168 = dma.done.wait [#allocation5], 4096  }
  0x15   :  { %2169 = vsyncadd [#allocation5], 4294963200  ;;  %v2947_v1 = vmov 0   ;;  %v1918_v2 = vld [vmem:[%s2941_s2 + $0x4] ss:$16 sps:$4 sm:$0xff]   ;;  %vm141_vm0 = vcmask 261120   ;;  %v61_v51 = vlaneseq }
  0x16   :  { %186 = vmatprep.mubr.bf16.mxu0 %v2947_v1  ;;  %259 = vmatprep.mubr.bf16.mxu1 %v2947_v1  ;;  %v1920_v3 = vld [vmem:[%s2941_s2 + $0xc] ss:$16 sps:$4 sm:$0xff]   ;;  %v1922_v4 = vld [vmem:[%s2941_s2] ss:$16 sps:$4 sm:$0xff]   ;;  %v1923_v5 = vld [vmem:[%s2941_s2 + $0x8] ss:$16 sps:$4 sm:$0xff]  }
  0x17   :  { %1916 = vset.pattern.permute.xlu0 %v2947_v1  ;;  %1917 = vset.pattern.permute.xlu1 %v2947_v1  ;;  %v1924_v6 = vld [vmem:[%s2941_s2 + $0x24] ss:$16 sps:$4 sm:$0xff]   ;;  %v1926_v7 = vld [vmem:[%s2941_s2 + $0x2c] ss:$16 sps:$4 sm:$0xff]   ;;  %v1928_v8 = vld [vmem:[%s2941_s2 + $0x20] ss:$16 sps:$4 sm:$0xff]  }
  0x18   :  { %154 = vmatprep.subr.bf16.mxu0 %v1918_v2  ;;  %227 = vmatprep.subr.bf16.mxu1 %v1920_v3  ;;  %v1929_v9 = vld [vmem:[%s2941_s2 + $0x28] ss:$16 sps:$4 sm:$0xff]   ;;  %v1930_v10 = vld [vmem:[%s2939_s0] sm:$0xff]   ;;  %v1956_v30 = vld [vmem:[%s2939_s0 + $0x10] sm:$0xff]   ;;  %v62_v52 = vshrl.u32 %v61_v51, 7 }
  0x19   :  { %155 = vmatpush1.bf16.msra.mxu0 %v1922_v4  ;;  %228 = vmatpush1.bf16.msra.mxu1 %v1923_v5  ;;  %v2263_v11 = vld [vmem:[#allocation4 + $0x4] ss:$16 sps:$4 sm:$0xff]   ;;  %v2265_v12 = vld [vmem:[#allocation4 + $0xc] ss:$16 sps:$4 sm:$0xff]   ;;  %v2267_v13 = vld [vmem:[#allocation4] ss:$16 sps:$4 sm:$0xff]  }
  0x1a   :  { %156 = vmatprep.subr.bf16.mxu0 %v1924_v6  ;;  %229 = vmatprep.subr.bf16.mxu1 %v1926_v7  ;;  %v2269_v14 = vld [vmem:[#allocation4 + $0x8] ss:$16 sps:$4 sm:$0xff]   ;;  %v2272_v15 = vld [vmem:[#allocation4 + $0x24] ss:$16 sps:$4 sm:$0xff]   ;;  %v2275_v16 = vld [vmem:[#allocation4 + $0x2c] ss:$16 sps:$4 sm:$0xff]  }
  0x1b   :  { %v2279_v17 = vld [vmem:[#allocation4 + $0x20] ss:$16 sps:$4 sm:$0xff]   ;;  %v2283_v18 = vld [vmem:[#allocation4 + $0x28] ss:$16 sps:$4 sm:$0xff]   ;;  %v2287_v19 = vld [vmem:[#allocation4 + $0x44] ss:$16 sps:$4 sm:$0xff]  }
  0x1c   :  { %v1943_v20 = vld [vmem:[%s2939_s0 + $0x8] sm:$0xff]   ;;  %v2296_v22 = vld [vmem:[#allocation4 + $0x40] ss:$16 sps:$4 sm:$0xff]   ;;  %v1969_v40 = vld [vmem:[%s2939_s0 + $0x18] sm:$0xff]   ;;  %v63_v53 = vsub.s32 0, %v62_v52  ;;  %v71_v54 = vsub.s32 2, %v62_v52 }
  0x1d   :  { %157 = vmatpush1.bf16.msra.mxu0 %v1928_v8  ;;  %230 = vmatpush1.bf16.msra.mxu1 %v1929_v9  ;;  %v2294_v21 = vld [vmem:[#allocation4 + $0x4c] ss:$16 sps:$4 sm:$0xff]   ;;  %v2300_v23 = vld [vmem:[#allocation4 + $0x48] ss:$16 sps:$4 sm:$0xff]   ;;  %v2304_v24 = vld [vmem:[#allocation4 + $0x64] ss:$16 sps:$4 sm:$0xff]  }
  0x1e   :  { %611 = vmatprep.subr.bf16.mxu0 %v2263_v11  ;;  %652 = vmatprep.subr.bf16.mxu1 %v2265_v12  ;;  %v2306_v25 = vld [vmem:[#allocation4 + $0x6c] ss:$16 sps:$4 sm:$0xff]   ;;  %v2310_v26 = vld [vmem:[#allocation4 + $0x60] ss:$16 sps:$4 sm:$0xff]   ;;  %v2314_v27 = vld [vmem:[#allocation4 + $0x68] ss:$16 sps:$4 sm:$0xff]  }
  0x1f   :  { %v2318_v28 = vld [vmem:[#allocation4 + $0x84] ss:$16 sps:$4 sm:$0xff]   ;;  %v2320_v29 = vld [vmem:[#allocation4 + $0x8c] ss:$16 sps:$4 sm:$0xff]   ;;  %v2327_v31 = vld [vmem:[#allocation4 + $0x80] ss:$16 sps:$4 sm:$0xff]  }
  0x20   :  { %1729 = vmatmul.mubr.msk.bf16.vlgmr.msra.gmra.mrb[0].mxu0 %vm141_vm0, %v1930_v10  ;;  %1733 = vmatmul.mubr.msk.bf16.vlgmr.msra.gmra.mrb[0].mxu1 %vm141_vm0, %v1930_v10  ;;  %v2329_v32 = vld [vmem:[#allocation4 + $0x88] ss:$16 sps:$4 sm:$0xff]   ;;  %v2333_v33 = vld [vmem:[#allocation4 + $0xa4] ss:$16 sps:$4 sm:$0xff]   ;;  %v2337_v34 = vld [vmem:[#allocation4 + $0xac] ss:$16 sps:$4 sm:$0xff]  }
  0x21   :  { %612 = vmatpush1.bf16.msra.mxu0 %v2267_v13  ;;  %653 = vmatpush1.bf16.msra.mxu1 %v2269_v14  ;;  %v2341_v35 = vld [vmem:[#allocation4 + $0xa0] ss:$16 sps:$4 sm:$0xff]   ;;  %v2343_v36 = vld [vmem:[#allocation4 + $0xa8] ss:$16 sps:$4 sm:$0xff]   ;;  %v2347_v37 = vld [vmem:[#allocation4 + $0xc4] ss:$16 sps:$4 sm:$0xff]  }
  0x22   :  { %613 = vmatprep.subr.bf16.mxu0 %v2272_v15  ;;  %654 = vmatprep.subr.bf16.mxu1 %v2275_v16  ;;  %v2351_v38 = vld [vmem:[#allocation4 + $0xcc] ss:$16 sps:$4 sm:$0xff]   ;;  %v2366_v41 = vld [vmem:[#allocation4 + $0xc0] ss:$16 sps:$4 sm:$0xff]   ;;  %v2368_v42 = vld [vmem:[#allocation4 + $0xc8] ss:$16 sps:$4 sm:$0xff]  }
  0x23   :  { %196 = vmatprep.mubr.bf16.mxu0 %v2947_v1  ;;  %269 = vmatprep.mubr.bf16.mxu1 %v2947_v1  ;;  %v2358_v39 = vld [vmem:[%s2940_s1] sm:$0xff]  ;;  %v2384_v47 = vld [vmem:[#allocation4 + $0xe8] ss:$16 sps:$4 sm:$0xff]   ;;  %v67_v56 = vsub.s32 1, %v62_v52  ;;  %v75_v57 = vsub.s32 3, %v62_v52 }
  0x24   :  { %vm721_vm1 = vcmp.gt.s32.totalorder %v2358_v39, 0  ;;  %v2373_v44 = vld [vmem:[#allocation4 + $0xe4] ss:$16 sps:$4 sm:$0xff]   ;;  %v2375_v45 = vld [vmem:[#allocation4 + $0xec] ss:$16 sps:$4 sm:$0xff]   ;;  %vm847_vm2 = vcmp.gt.s32.totalorder %v2358_v39, 1 }
  0x25   :  { %614 = vmatpush1.bf16.msra.mxu0 %v2279_v17  ;;  %655 = vmatpush1.bf16.msra.mxu1 %v2283_v18  ;;  %v722_v43 = vsel %vm721_vm1, 1, %v2947_v1  ;;  %v2382_v46 = vld [vmem:[#allocation4 + $0xe0] ss:$16 sps:$4 sm:$0xff]   ;;  %v848_v48 = vsel %vm847_vm2, 1, %v2947_v1  ;;  %vm1225_vm3 = vcmp.gt.s32.totalorder %v2358_v39, 4  ;;  %vm1477_vm4 = vcmp.gt.s32.totalorder %v2358_v39, 6 }
  0x26   :  { %615 = vmatprep.subr.bf16.mxu0 %v2287_v19  ;;  %656 = vmatprep.subr.bf16.mxu1 %v2294_v21  ;;  %v1226_v49 = vsel %vm1225_vm3, 1, %v2947_v1  ;;  %v1478_v50 = vsel %vm1477_vm4, 1, %v2947_v1  ;;  %v59_v55 = vld [vmem:[%s2943_s4] sm:$0xf]  ;;  %vm973_vm7 = vcmp.gt.s32.totalorder %v2358_v39, 2  ;;  %vm1099_vm8 = vcmp.gt.s32.totalorder %v2358_v39, 3 }
  0x27   :  { %724 = vperm.xlu0 %1916, %v722_v43   ;;  %v2438_v58 = vrot.slane %v59_v55, %v63_v53  ;;  %v2440_v59 = vrot.slane %v59_v55, %v71_v54  ;;  %v2442_v60 = vrot.slane %v59_v55, %v67_v56  ;;  %v2444_v61 = vrot.slane %v59_v55, %v75_v57 }
  0x28   :  { %1730 = vmatmul.mubr.msk.bf16.gmra.mrb[4].mxu0 %vm141_vm0, %v1943_v20  ;;  %1734 = vmatmul.mubr.msk.bf16.gmra.mrb[4].mxu1 %vm141_vm0, %v1943_v20  ;;  %vm1351_vm9 = vcmp.gt.s32.totalorder %v2358_v39, 5  ;;  %vm1603_vm10 = vcmp.gt.s32.totalorder %v2358_v39, 7  ;;  %vm2175_vm1 = vmmov 0   ;;  %vm1710_vm3 = vcmask 7168  }
  0x29   :  { %616 = vmatpush1.bf16.msra.mxu0 %v2296_v22  ;;  %657 = vmatpush1.bf16.msra.mxu1 %v2300_v23 }
  0x2a   :  { %617 = vmatprep.subr.bf16.mxu0 %v2304_v24  ;;  %658 = vmatprep.subr.bf16.mxu1 %v2306_v25 }
  0x2b   :  { %206 = vmatprep.mubr.bf16.mxu0 %v2947_v1  ;;  %279 = vmatprep.mubr.bf16.mxu1 %v2947_v1 }
  0x2c   :  { %850 = vperm.xlu0 %1916, %v848_v48  }
  0x2d   :  { %618 = vmatpush1.bf16.msra.mxu0 %v2310_v26  ;;  %659 = vmatpush1.bf16.msra.mxu1 %v2314_v27 }
  0x2e   :  { %619 = vmatprep.subr.bf16.mxu0 %v2318_v28  ;;  %660 = vmatprep.subr.bf16.mxu1 %v2320_v29 }
  0x30   :  { %1731 = vmatmul.mubr.msk.bf16.gmra.mrb[8].mxu0 %vm141_vm0, %v1956_v30  ;;  %1735 = vmatmul.mubr.msk.bf16.gmra.mrb[8].mxu1 %vm141_vm0, %v1956_v30 }
  0x31   :  { %620 = vmatpush1.bf16.msra.mxu0 %v2327_v31  ;;  %661 = vmatpush1.bf16.msra.mxu1 %v2329_v32 }
  0x32   :  { %621 = vmatprep.subr.bf16.mxu0 %v2333_v33  ;;  %662 = vmatprep.subr.bf16.mxu1 %v2337_v34 }
  0x33   :  { %216 = vmatprep.mubr.bf16.mxu0 %v2947_v1  ;;  %289 = vmatprep.mubr.bf16.mxu1 %v2947_v1 }
  0x34   :  { %1228 = vperm.xlu0 %1916, %v1226_v49  }
  0x35   :  { %622 = vmatpush1.bf16.msra.mxu0 %v2341_v35  ;;  %663 = vmatpush1.bf16.msra.mxu1 %v2343_v36 }
  0x36   :  { %623 = vmatprep.subr.bf16.mxu0 %v2347_v37  ;;  %664 = vmatprep.subr.bf16.mxu1 %v2351_v38 }
  0x38   :  { %1732 = vmatmul.mubr.msk.bf16.gmra.mrb[12].mxu0 %vm141_vm0, %v1969_v40  ;;  %1736 = vmatmul.mubr.msk.bf16.gmra.mrb[12].mxu1 %vm141_vm0, %v1969_v40 }
  0x39   :  { %624 = vmatpush1.bf16.msra.mxu0 %v2366_v41  ;;  %665 = vmatpush1.bf16.msra.mxu1 %v2368_v42 }
  0x3a   :  { %625 = vmatprep.subr.bf16.mxu0 %v2373_v44  ;;  %666 = vmatprep.subr.bf16.mxu1 %v2375_v45 }
  0x3b   :  { %643 = vmatprep.mubr.bf16.mxu0 %v2947_v1  ;;  %684 = vmatprep.mubr.bf16.mxu1 %v2947_v1 }
  0x3c   :  { %1480 = vperm.xlu0 %1916, %v1478_v50  }
  0x3d   :  { %626 = vmatpush1.bf16.msra.mxu0 %v2382_v46  ;;  %667 = vmatpush1.bf16.msra.mxu1 %v2384_v47 }
  0x3e   :  { %737 = vmatprep.subr.bf16.mxu0 %v2263_v11  ;;  %778 = vmatprep.subr.bf16.mxu1 %v2265_v12 }
  0x40   :  { %644 = vmatmul.mubr.bf16.vlgmr.msra.gmra.mrb[16].mxu0 %v2947_v1  ;;  %685 = vmatmul.mubr.bf16.vlgmr.msra.gmra.mrb[16].mxu1 %v2947_v1 }
  0x41   :  { %738 = vmatpush1.bf16.msra.mxu0 %v2267_v13  ;;  %779 = vmatpush1.bf16.msra.mxu1 %v2269_v14 }
  0x42   :  { %739 = vmatprep.subr.bf16.mxu0 %v2272_v15  ;;  %780 = vmatprep.subr.bf16.mxu1 %v2275_v16 }
  0x43   :  { %769 = vmatprep.mubr.bf16.mxu0 %v2947_v1  ;;  %810 = vmatprep.mubr.bf16.mxu1 %v2947_v1 }
  0x45   :  { %740 = vmatpush1.bf16.msra.mxu0 %v2279_v17  ;;  %781 = vmatpush1.bf16.msra.mxu1 %v2283_v18 }
  0x46   :  { %741 = vmatprep.subr.bf16.mxu0 %v2287_v19  ;;  %782 = vmatprep.subr.bf16.mxu1 %v2294_v21 }
  0x49   :  { %742 = vmatpush1.bf16.msra.mxu0 %v2296_v22  ;;  %783 = vmatpush1.bf16.msra.mxu1 %v2300_v23 }
  0x4a   :  { %743 = vmatprep.subr.bf16.mxu0 %v2304_v24  ;;  %784 = vmatprep.subr.bf16.mxu1 %v2306_v25 }
  0x4d   :  { %744 = vmatpush1.bf16.msra.mxu0 %v2310_v26  ;;  %785 = vmatpush1.bf16.msra.mxu1 %v2314_v27 }
  0x4e   :  { %745 = vmatprep.subr.bf16.mxu0 %v2318_v28  ;;  %786 = vmatprep.subr.bf16.mxu1 %v2320_v29 }
  0x51   :  { %746 = vmatpush1.bf16.msra.mxu0 %v2327_v31  ;;  %787 = vmatpush1.bf16.msra.mxu1 %v2329_v32 }
  0x52   :  { %747 = vmatprep.subr.bf16.mxu0 %v2333_v33  ;;  %788 = vmatprep.subr.bf16.mxu1 %v2337_v34 }
  0x55   :  { %748 = vmatpush1.bf16.msra.mxu0 %v2341_v35  ;;  %789 = vmatpush1.bf16.msra.mxu1 %v2343_v36 }
  0x56   :  { %749 = vmatprep.subr.bf16.mxu0 %v2347_v37  ;;  %790 = vmatprep.subr.bf16.mxu1 %v2351_v38 }
  0x59   :  { %750 = vmatpush1.bf16.msra.mxu0 %v2366_v41  ;;  %791 = vmatpush1.bf16.msra.mxu1 %v2368_v42 }
  0x5a   :  { %751 = vmatprep.subr.bf16.mxu0 %v2373_v44  ;;  %792 = vmatprep.subr.bf16.mxu1 %v2375_v45 }
  0x5d   :  { %752 = vmatpush1.bf16.msra.mxu0 %v2382_v46  ;;  %793 = vmatpush1.bf16.msra.mxu1 %v2384_v47 }
  0x5e   :  { %863 = vmatprep.subr.bf16.mxu0 %v2263_v11  ;;  %904 = vmatprep.subr.bf16.mxu1 %v2265_v12 }
  0xf3   :  { %v188_v62 = vpop.f32.mrb[0].mxu0  ;;  %v261_v63 = vpop.f32.mrb[0].mxu1 }
  0xf4   :  { %v189_v0 = vadd.f32 %v188_v62, %v2438_v58  ;;  %v190_v2 = vpop.f32.mrb[1].mxu0  ;;  %v262_v3 = vadd.f32 %v261_v63, %v2440_v59  ;;  %v263_v4 = vpop.f32.mrb[1].mxu1 }
  0xf5   :  { %v191_v5 = vadd.f32 %v190_v2, %v2442_v60  ;;  %v192_v6 = vpop.f32.mrb[2].mxu0  ;;  %v264_v7 = vadd.f32 %v263_v4, %v2444_v61  ;;  %v265_v8 = vpop.f32.mrb[2].mxu1 }
  0xf6   :  { %v193_v9 = vadd.f32 %v192_v6, %v2438_v58  ;;  %v194_v10 = vpop.f32.mrb[3].mxu0  ;;  %v266_v20 = vadd.f32 %v265_v8, %v2440_v59  ;;  %v267_v30 = vpop.f32.mrb[3].mxu1 }
  0xf7   :  { %v2452_v40 = vpack.c.bf16 %v191_v5, %v189_v0  ;;  %v195_v43 = vadd.f32 %v194_v10, %v2442_v60  ;;  %v2455_v48 = vpack.c.bf16 %v264_v7, %v262_v3  ;;  %v268_v49 = vadd.f32 %v267_v30, %v2444_v61 }
  0xf9   :  { %v2458_v50 = vpack.c.bf16 %v195_v43, %v193_v9  ;;  %v2460_v51 = vpack.c.bf16 %v268_v49, %v266_v20 }
  0xfb   :  { %v198_v52 = vpop.f32.mrb[4].mxu0  ;;  %v271_v53 = vpop.f32.mrb[4].mxu1 }
  0xfc   :  { %v199_v54 = vadd.f32 %v198_v52, %v2438_v58  ;;  %v200_v55 = vpop.f32.mrb[5].mxu0  ;;  %v272_v56 = vadd.f32 %v271_v53, %v2440_v59  ;;  %v273_v57 = vpop.f32.mrb[5].mxu1 }
  0xfd   :  { %v201_v62 = vadd.f32 %v200_v55, %v2442_v60  ;;  %v202_v63 = vpop.f32.mrb[6].mxu0  ;;  %v274_v0 = vadd.f32 %v273_v57, %v2444_v61  ;;  %v275_v2 = vpop.f32.mrb[6].mxu1 }
  0xfe   :  { %v203_v3 = vadd.f32 %v202_v63, %v2438_v58  ;;  %v204_v4 = vpop.f32.mrb[7].mxu0  ;;  %v276_v5 = vadd.f32 %v275_v2, %v2440_v59  ;;  %v277_v6 = vpop.f32.mrb[7].mxu1 }
  0xff   :  { %v2468_v7 = vpack.c.bf16 %v201_v62, %v199_v54  ;;  %v205_v8 = vadd.f32 %v204_v4, %v2442_v60  ;;  %v2471_v9 = vpack.c.bf16 %v274_v0, %v272_v56  ;;  %v278_v10 = vadd.f32 %v277_v6, %v2444_v61 }
 0x101   :  { %v2474_v20 = vpack.c.bf16 %v205_v8, %v203_v3  ;;  %v2476_v30 = vpack.c.bf16 %v278_v10, %v276_v5 }
 0x103   :  { %2956 = vst [vmem:[#allocation7_spill] sm:$0xff] %v2476_v30  ;;  %v208_v43 = vpop.f32.mrb[8].mxu0  ;;  %v281_v49 = vpop.f32.mrb[8].mxu1 }
 0x104   :  { %v209_v52 = vadd.f32 %v208_v43, %v2438_v58  ;;  %v210_v53 = vpop.f32.mrb[9].mxu0  ;;  %v282_v55 = vadd.f32 %v281_v49, %v2440_v59  ;;  %v283_v57 = vpop.f32.mrb[9].mxu1 }
 0x105   :  { %v211_v54 = vadd.f32 %v210_v53, %v2442_v60  ;;  %v212_v62 = vpop.f32.mrb[10].mxu0  ;;  %v284_v56 = vadd.f32 %v283_v57, %v2444_v61  ;;  %v285_v63 = vpop.f32.mrb[10].mxu1 }
 0x106   :  { %v213_v0 = vadd.f32 %v212_v62, %v2438_v58  ;;  %v214_v2 = vpop.f32.mrb[11].mxu0  ;;  %v286_v3 = vadd.f32 %v285_v63, %v2440_v59  ;;  %v287_v4 = vpop.f32.mrb[11].mxu1 }
 0x107   :  { %v2484_v5 = vpack.c.bf16 %v211_v54, %v209_v52  ;;  %v215_v6 = vadd.f32 %v214_v2, %v2442_v60  ;;  %v2487_v8 = vpack.c.bf16 %v284_v56, %v282_v55  ;;  %v288_v10 = vadd.f32 %v287_v4, %v2444_v61 }
 0x109   :  { %v2490_v43 = vpack.c.bf16 %v215_v6, %v213_v0  ;;  %v2492_v49 = vpack.c.bf16 %v288_v10, %v286_v3 }
 0x10b   :  { %2957 = vst [vmem:[#allocation8_spill] sm:$0xff] %v2490_v43  ;;  %2958 = vst [vmem:[#allocation9_spill] sm:$0xff] %v2492_v49  ;;  %v218_v53 = vpop.f32.mrb[12].mxu0  ;;  %v291_v57 = vpop.f32.mrb[12].mxu1 }
 0x10c   :  { %v219_v62 = vadd.f32 %v218_v53, %v2438_v58  ;;  %v220_v1 = vpop.f32.mrb[13].mxu0  ;;  %v292_v63 = vadd.f32 %v291_v57, %v2440_v59  ;;  %v293_v30 = vpop.f32.mrb[13].mxu1 }
 0x10d   :  { %v221_v52 = vadd.f32 %v220_v1, %v2442_v60  ;;  %v222_v54 = vpop.f32.mrb[14].mxu0  ;;  %v294_v55 = vadd.f32 %v293_v30, %v2444_v61  ;;  %v295_v56 = vpop.f32.mrb[14].mxu1  ;;  %v447_v30 = vunpack.c.l.bf16 %v2452_v40 }
 0x10e   :  { %v223_v2 = vadd.f32 %v222_v54, %v2438_v58  ;;  %v224_v0 = vpop.f32.mrb[15].mxu0  ;;  %v296_v3 = vadd.f32 %v295_v56, %v2440_v59  ;;  %v297_v4 = vpop.f32.mrb[15].mxu1  ;;  %v449_v58 = vunpack.c.l.bf16 %v2455_v48  ;;  %v448_v59 = vunpack.c.h.bf16 %v2452_v40 }
 0x10f   :  { %v2500_v6 = vpack.c.bf16 %v221_v52, %v219_v62  ;;  %v225_v10 = vadd.f32 %v224_v0, %v2442_v60  ;;  %v2503_v53 = vpack.c.bf16 %v294_v55, %v292_v63  ;;  %v298_v57 = vadd.f32 %v297_v4, %v2444_v61 }
 0x110   :  { %v450_v62 = vunpack.c.h.bf16 %v2455_v48 }
 0x111   :  { %2959 = vst [vmem:[#allocation10_spill] sm:$0xff] %v2500_v6  ;;  %2960 = vst [vmem:[#allocation11_spill] sm:$0xff] %v2503_v53  ;;  %v2506_v49 = vpack.c.bf16 %v225_v10, %v223_v2  ;;  %v2508_v1 = vpack.c.bf16 %v298_v57, %v296_v3 }
 0x113   :  { %2961 = vst [vmem:[#allocation12_spill] sm:$0xff] %v2506_v49  ;;  %2962 = vst [vmem:[#allocation13_spill] sm:$0xff] %v2508_v1  ;;  %v645_v54 = vpop.f32.mrb[16].mxu0  ;;  %v686_v43 = vpop.f32.mrb[16].mxu1 }
 0x114   :  { %v693_v52 = vadd.f32 %v645_v54, %v447_v30  ;;  %v695_v60 = vadd.f32 %v686_v43, %v449_v58  ;;  %v647_v63 = vpop.f32.mrb[17].mxu0  ;;  %v688_v55 = vpop.f32.mrb[17].mxu1 }
 0x115   :  { %v694_v56 = vadd.f32 %v647_v63, %v448_v59  ;;  %v696_v61 = vadd.f32 %v688_v55, %v450_v62  ;;  %v649_v2 = vpop.f32.mrb[18].mxu0  ;;  %v690_v0 = vpop.f32.mrb[18].mxu1 }
 0x116   :  { %v1785_v3 = vmul.f32 -1.442695, %v693_v52  ;;  %v650_v4 = vpop.f32.mrb[19].mxu0  ;;  %v691_v10 = vpop.f32.mrb[19].mxu1 }
 0x117   :  { %v1786_v57 = vmul.f32 -1.442695, %v694_v56  ;;  %v1787_v1 = vmul.f32 -1.442695, %v696_v61  ;;  %v2517_v55 = vpop.permute.xlu0 %724  ;;  %v2963_v56 = vmov 0   ;;  %v732_v4 = vunpack.c.l.bf16 %v2458_v50 }
 0x118   :  { %1982 = vpow2.f32 %v1785_v3  ;;  %vm726_vm5 = vcmp.eq.s32.totalorder %v2517_v55, 1  ;;  %v974_v61 = vsel %vm973_vm7, 1, %v2963_v56  ;;  %v1100_v2 = vsel %vm1099_vm8, 1, %v2963_v56 }
 0x119   :  { %1984 = vpow2.f32 %v1786_v57  ;;  %vm1788_vm6 = vmpackc.low %vm726_vm5, %vm726_vm5  ;;  %976 = vperm.xlu1 %1917, %v974_v61   ;;  %v1352_v0 = vsel %vm1351_vm9, 1, %v2963_v56  ;;  %v1604_v3 = vsel %vm1603_vm10, 1, %v2963_v56  ;;  %v734_v10 = vunpack.c.l.bf16 %v2460_v51 }
 0x11a   :  { %1986 = vpow2.f32 %v1787_v1  ;;  %v858_v55 = vunpack.c.l.bf16 %v2468_v7 }
 0x11b   :  { %1988 = vtanh.f32 %v695_v60 }
 0x11d   :  { %1102 = vperm.xlu1 %1917, %v1100_v2  }
 0x121   :  { %1354 = vperm.xlu1 %1917, %v1352_v0  }
 0x122   :  { %v1983_v49 = vpop.eup %1982 }
 0x123   :  { %v1985_v53 = vpop.eup %1984  ;;  %v700_v40 = vadd.f32 1.0, %v1983_v49 }
 0x124   :  { %v706_v48 = vadd.f32 1.0, %v1985_v53  ;;  %v1987_v43 = vpop.eup %1986 }
 0x125   :  { %1990 = vrcp.f32 %v700_v40  ;;  %v1989_v30 = vpop.eup %1988  ;;  %v713_v59 = vadd.f32 1.0, %v1987_v43  ;;  %1606 = vperm.xlu1 %1917, %v1604_v3   ;;  %v735_v43 = vunpack.c.h.bf16 %v2460_v51 }
 0x126   :  { %1992 = vrcp.f32 %v706_v48  ;;  %v733_v48 = vunpack.c.h.bf16 %v2458_v50 }
 0x127   :  { %1994 = vrcp.f32 %v713_v59 }
 0x12f   :  { %v1991_v58 = vpop.eup %1990 }
 0x130   :  { %v1993_v54 = vpop.eup %1992  ;;  %v717_v62 = vmul.f32 %v1991_v58, %v1989_v30 }
 0x131   :  { %v716_v52 = vmul.f32 0.0, %v1993_v54  ;;  %v1995_v49 = vpop.eup %1994 }
 0x133   :  { %v2514_v63 = vadd.f32 %v717_v62, %v716_v52 }
 0x135   :  { %1996 = vtanh.f32 %v2514_v63 }
 0x13f   :  { %v1997_v1 = vpop.eup %1996 }
 0x140   :  { %v2519_v60 = vmul.f32 %v1997_v1, %v1995_v49 }
 0x142   :  { %v1789_v53 = vpack.c.bf16 %v2519_v60, %v2519_v60 }
 0x144   :  { %1790 = vmatmul.mubr.msk.bf16.vlgmr.msra.gmra.mrb[20].mxu0 %vm1788_vm6, %v1789_v53  ;;  %1793 = vmatmul.mubr.msk.bf16.vlgmr.msra.gmra.mrb[20].mxu1 %vm1788_vm6, %v1789_v53 }
 0x145   :  { %864 = vmatpush1.bf16.msra.mxu0 %v2267_v13  ;;  %905 = vmatpush1.bf16.msra.mxu1 %v2269_v14 }
 0x146   :  { %865 = vmatprep.subr.bf16.mxu0 %v2272_v15  ;;  %906 = vmatprep.subr.bf16.mxu1 %v2275_v16 }
 0x147   :  { %895 = vmatprep.mubr.bf16.mxu0 %v2963_v56  ;;  %936 = vmatprep.mubr.bf16.mxu1 %v2963_v56 }
 0x149   :  { %866 = vmatpush1.bf16.msra.mxu0 %v2279_v17  ;;  %907 = vmatpush1.bf16.msra.mxu1 %v2283_v18 }
 0x14a   :  { %867 = vmatprep.subr.bf16.mxu0 %v2287_v19  ;;  %908 = vmatprep.subr.bf16.mxu1 %v2294_v21 }
 0x14d   :  { %868 = vmatpush1.bf16.msra.mxu0 %v2296_v22  ;;  %909 = vmatpush1.bf16.msra.mxu1 %v2300_v23 }
 0x14e   :  { %869 = vmatprep.subr.bf16.mxu0 %v2304_v24  ;;  %910 = vmatprep.subr.bf16.mxu1 %v2306_v25 }
 0x151   :  { %870 = vmatpush1.bf16.msra.mxu0 %v2310_v26  ;;  %911 = vmatpush1.bf16.msra.mxu1 %v2314_v27 }
 0x152   :  { %871 = vmatprep.subr.bf16.mxu0 %v2318_v28  ;;  %912 = vmatprep.subr.bf16.mxu1 %v2320_v29 }
 0x155   :  { %872 = vmatpush1.bf16.msra.mxu0 %v2327_v31  ;;  %913 = vmatpush1.bf16.msra.mxu1 %v2329_v32 }
 0x156   :  { %873 = vmatprep.subr.bf16.mxu0 %v2333_v33  ;;  %914 = vmatprep.subr.bf16.mxu1 %v2337_v34 }
 0x159   :  { %874 = vmatpush1.bf16.msra.mxu0 %v2341_v35  ;;  %915 = vmatpush1.bf16.msra.mxu1 %v2343_v36 }
 0x15a   :  { %875 = vmatprep.subr.bf16.mxu0 %v2347_v37  ;;  %916 = vmatprep.subr.bf16.mxu1 %v2351_v38 }
 0x15d   :  { %876 = vmatpush1.bf16.msra.mxu0 %v2366_v41  ;;  %917 = vmatpush1.bf16.msra.mxu1 %v2368_v42 }
 0x15e   :  { %877 = vmatprep.subr.bf16.mxu0 %v2373_v44  ;;  %918 = vmatprep.subr.bf16.mxu1 %v2375_v45 }
 0x161   :  { %878 = vmatpush1.bf16.msra.mxu0 %v2382_v46  ;;  %919 = vmatpush1.bf16.msra.mxu1 %v2384_v47 }
 0x162   :  { %989 = vmatprep.subr.bf16.mxu0 %v2263_v11  ;;  %1030 = vmatprep.subr.bf16.mxu1 %v2265_v12 }
 0x217   :  { %v771_v57 = vpop.f32.mrb[20].mxu0  ;;  %v812_v40 = vpop.f32.mrb[20].mxu1 }
 0x218   :  { %v819_v30 = vadd.f32 %v771_v57, %v732_v4  ;;  %v821_v58 = vadd.f32 %v812_v40, %v734_v10  ;;  %v773_v54 = vpop.f32.mrb[21].mxu0  ;;  %v814_v59 = vpop.f32.mrb[21].mxu1 }
 0x219   :  { %v820_v62 = vadd.f32 %v773_v54, %v733_v48  ;;  %v822_v39 = vadd.f32 %v814_v59, %v735_v43  ;;  %v775_v52 = vpop.f32.mrb[22].mxu0  ;;  %v816_v49 = vpop.f32.mrb[22].mxu1  ;;  %v728_v48 = vsel %vm726_vm5, %v2514_v63, 0.0 }
 0x21a   :  { %v1794_v1 = vmul.f32 -1.442695, %v819_v30  ;;  %v776_v53 = vpop.f32.mrb[23].mxu0  ;;  %v817_v61 = vpop.f32.mrb[23].mxu1  ;;  %v727_v49 = vsel %vm726_vm5, %v2519_v60, 0.0  ;;  %v860_v60 = vunpack.c.l.bf16 %v2471_v9 }
 0x21b   :  { %v1795_v2 = vmul.f32 -1.442695, %v820_v62  ;;  %v1796_v0 = vmul.f32 -1.442695, %v822_v39  ;;  %v851_v59 = vpop.permute.xlu0 %850 }
 0x21c   :  { %1998 = vpow2.f32 %v1794_v1  ;;  %vm852_vm11 = vcmp.eq.s32.totalorder %v851_v59, 1 }
 0x21d   :  { %2000 = vpow2.f32 %v1795_v2  ;;  %v859_v2 = vunpack.c.h.bf16 %v2468_v7 }
 0x21e   :  { %2002 = vpow2.f32 %v1796_v0  ;;  %v861_v0 = vunpack.c.h.bf16 %v2471_v9 }
 0x21f   :  { %2004 = vtanh.f32 %v821_v58 }
 0x226   :  { %v1999_v3 = vpop.eup %1998 }
 0x227   :  { %v2001_v6 = vpop.eup %2000  ;;  %v826_v50 = vadd.f32 1.0, %v1999_v3 }
 0x228   :  { %v832_v51 = vadd.f32 1.0, %v2001_v6  ;;  %v2003_v4 = vpop.eup %2002 }
 0x229   :  { %2006 = vrcp.f32 %v826_v50  ;;  %v2005_v10 = vpop.eup %2004  ;;  %v839_v30 = vadd.f32 1.0, %v2003_v4 }
 0x22a   :  { %2008 = vrcp.f32 %v832_v51 }
 0x22b   :  { %2010 = vrcp.f32 %v839_v30 }
 0x233   :  { %v2007_v57 = vpop.eup %2006 }
 0x234   :  { %v2009_v40 = vpop.eup %2008  ;;  %v843_v43 = vmul.f32 %v2007_v57, %v2005_v10 }
 0x235   :  { %v842_v54 = vmul.f32 %v2009_v40, %v728_v48  ;;  %v2011_v6 = vpop.eup %2010 }
 0x237   :  { %v844_v62 = vadd.f32 %v843_v43, %v842_v54 }
 0x239   :  { %2012 = vtanh.f32 %v844_v62  ;;  %v2576_v58 = vsel %vm852_vm11, %v844_v62, %v728_v48 }
 0x243   :  { %v2013_v39 = vpop.eup %2012 }
 0x244   :  { %v846_v52 = vmul.f32 %v2013_v39, %v2011_v6 }
 0x246   :  { %v2581_v1 = vsel %vm852_vm11, %v846_v52, %v727_v49  ;;  %v977_v49 = vpop.permute.xlu1 %976 }
 0x247   :  { %v862_v63 = vpack.c.bf16 %v2581_v1, %v2581_v1  ;;  %vm978_vm12 = vcmp.eq.s32.totalorder %v977_v49, 1 }
 0x249   :  { %896 = vmatmul.mubr.bf16.vlgmr.msra.gmra.mrb[24].mxu0 %v862_v63  ;;  %937 = vmatmul.mubr.bf16.vlgmr.msra.gmra.mrb[24].mxu1 %v862_v63 }
 0x24a   :  { %990 = vmatpush1.bf16.msra.mxu0 %v2267_v13  ;;  %1031 = vmatpush1.bf16.msra.mxu1 %v2269_v14 }
 0x24b   :  { %991 = vmatprep.subr.bf16.mxu0 %v2272_v15  ;;  %1032 = vmatprep.subr.bf16.mxu1 %v2275_v16 }
 0x24c   :  { %1021 = vmatprep.mubr.bf16.mxu0 %v2963_v56  ;;  %1062 = vmatprep.mubr.bf16.mxu1 %v2963_v56 }
 0x24e   :  { %992 = vmatpush1.bf16.msra.mxu0 %v2279_v17  ;;  %1033 = vmatpush1.bf16.msra.mxu1 %v2283_v18 }
 0x24f   :  { %993 = vmatprep.subr.bf16.mxu0 %v2287_v19  ;;  %1034 = vmatprep.subr.bf16.mxu1 %v2294_v21 }
 0x252   :  { %994 = vmatpush1.bf16.msra.mxu0 %v2296_v22  ;;  %1035 = vmatpush1.bf16.msra.mxu1 %v2300_v23 }
 0x253   :  { %995 = vmatprep.subr.bf16.mxu0 %v2304_v24  ;;  %1036 = vmatprep.subr.bf16.mxu1 %v2306_v25 }
 0x256   :  { %996 = vmatpush1.bf16.msra.mxu0 %v2310_v26  ;;  %1037 = vmatpush1.bf16.msra.mxu1 %v2314_v27 }
 0x257   :  { %997 = vmatprep.subr.bf16.mxu0 %v2318_v28  ;;  %1038 = vmatprep.subr.bf16.mxu1 %v2320_v29 }
 0x25a   :  { %998 = vmatpush1.bf16.msra.mxu0 %v2327_v31  ;;  %1039 = vmatpush1.bf16.msra.mxu1 %v2329_v32 }
 0x25b   :  { %999 = vmatprep.subr.bf16.mxu0 %v2333_v33  ;;  %1040 = vmatprep.subr.bf16.mxu1 %v2337_v34 }
 0x25e   :  { %1000 = vmatpush1.bf16.msra.mxu0 %v2341_v35  ;;  %1041 = vmatpush1.bf16.msra.mxu1 %v2343_v36 }
 0x25f   :  { %1001 = vmatprep.subr.bf16.mxu0 %v2347_v37  ;;  %1042 = vmatprep.subr.bf16.mxu1 %v2351_v38 }
 0x262   :  { %1002 = vmatpush1.bf16.msra.mxu0 %v2366_v41  ;;  %1043 = vmatpush1.bf16.msra.mxu1 %v2368_v42 }
 0x263   :  { %1003 = vmatprep.subr.bf16.mxu0 %v2373_v44  ;;  %1044 = vmatprep.subr.bf16.mxu1 %v2375_v45 }
 0x266   :  { %1004 = vmatpush1.bf16.msra.mxu0 %v2382_v46  ;;  %1045 = vmatpush1.bf16.msra.mxu1 %v2384_v47 }
 0x267   :  { %1115 = vmatprep.subr.bf16.mxu0 %v2263_v11  ;;  %1156 = vmatprep.subr.bf16.mxu1 %v2265_v12 }
 0x31c   :  { %v897_v53 = vpop.f32.mrb[24].mxu0  ;;  %v938_v61 = vpop.f32.mrb[24].mxu1 }
 0x31d   :  { %v945_v3 = vadd.f32 %v897_v53, %v858_v55  ;;  %v947_v50 = vadd.f32 %v938_v61, %v860_v60  ;;  %v899_v51 = vpop.f32.mrb[25].mxu0  ;;  %v940_v4 = vpop.f32.mrb[25].mxu1 }
 0x31e   :  { %v946_v10 = vadd.f32 %v899_v51, %v859_v2  ;;  %v948_v57 = vadd.f32 %v940_v4, %v861_v0  ;;  %v901_v40 = vpop.f32.mrb[26].mxu0  ;;  %v942_v11 = vpop.f32.mrb[26].mxu1 }
 0x31f   :  { %v1797_v48 = vmul.f32 -1.442695, %v945_v3  ;;  %v902_v12 = vpop.f32.mrb[27].mxu0  ;;  %v943_v43 = vpop.f32.mrb[27].mxu1 }
 0x320   :  { %v1798_v30 = vmul.f32 -1.442695, %v946_v10  ;;  %v1799_v54 = vmul.f32 -1.442695, %v948_v57 }
 0x321   :  { %2014 = vpow2.f32 %v1797_v48 }
 0x322   :  { %2016 = vpow2.f32 %v1798_v30 }
 0x323   :  { %2018 = vpow2.f32 %v1799_v54 }
 0x324   :  { %2020 = vtanh.f32 %v947_v50 }
 0x32b   :  { %v2015_v59 = vpop.eup %2014 }
 0x32c   :  { %v2017_v62 = vpop.eup %2016  ;;  %v952_v7 = vadd.f32 1.0, %v2015_v59 }
 0x32d   :  { %v958_v9 = vadd.f32 1.0, %v2017_v62  ;;  %v2019_v6 = vpop.eup %2018  ;;  %v1103_v62 = vpop.permute.xlu1 %1102 }
 0x32e   :  { %2022 = vrcp.f32 %v952_v7  ;;  %v2021_v39 = vpop.eup %2020  ;;  %v965_v55 = vadd.f32 1.0, %v2019_v6  ;;  %vm1104_vm13 = vcmp.eq.s32.totalorder %v1103_v62, 1 }
 0x32f   :  { %2024 = vrcp.f32 %v958_v9 }
 0x330   :  { %2026 = vrcp.f32 %v965_v55  ;;  %v2683_v55 = vld [vmem:[#allocation4] ss:$16 sps:$4 sm:$0xff]  }
 0x338   :  { %v2023_v52 = vpop.eup %2022 }
 0x339   :  { %v2025_v63 = vpop.eup %2024  ;;  %v969_v60 = vmul.f32 %v2023_v52, %v2021_v39 }
 0x33a   :  { %v968_v53 = vmul.f32 %v2025_v63, %v2576_v58  ;;  %v2027_v0 = vpop.eup %2026 }
 0x33c   :  { %v970_v61 = vadd.f32 %v969_v60, %v968_v53  ;;  %v2686_v60 = vld [vmem:[#allocation4 + $0x8] ss:$16 sps:$4 sm:$0xff]   ;;  %v2689_v53 = vld [vmem:[#allocation4 + $0x24] ss:$16 sps:$4 sm:$0xff]  }
 0x33e   :  { %2028 = vtanh.f32 %v970_v61  ;;  %v2625_v2 = vsel %vm978_vm12, %v970_v61, %v2576_v58  ;;  %v2692_v61 = vld [vmem:[#allocation4 + $0x2c] ss:$16 sps:$4 sm:$0xff]  }
 0x348   :  { %v2029_v3 = vpop.eup %2028 }
 0x349   :  { %v972_v50 = vmul.f32 %v2029_v3, %v2027_v0  ;;  %v2700_v0 = vld [vmem:[#allocation4 + $0x28] ss:$16 sps:$4 sm:$0xff]   ;;  %v2703_v3 = vld [vmem:[#allocation4 + $0x44] ss:$16 sps:$4 sm:$0xff]  }
 0x34b   :  { %v2628_v51 = vsel %vm978_vm12, %v972_v50, %v2581_v1  ;;  %v2706_v50 = vld [vmem:[#allocation4 + $0x4c] ss:$16 sps:$4 sm:$0xff]  }
 0x34c   :  { %v988_v4 = vpack.c.bf16 %v2628_v51, %v2628_v51 }
 0x34e   :  { %1022 = vmatmul.mubr.bf16.vlgmr.msra.gmra.mrb[28].mxu0 %v988_v4  ;;  %1063 = vmatmul.mubr.bf16.vlgmr.msra.gmra.mrb[28].mxu1 %v988_v4  ;;  %v2712_v4 = vld [vmem:[#allocation4 + $0x48] ss:$16 sps:$4 sm:$0xff]  }
 0x34f   :  { %1116 = vmatpush1.bf16.msra.mxu0 %v2267_v13  ;;  %1157 = vmatpush1.bf16.msra.mxu1 %v2269_v14  ;;  %v2664_v13 = vld [vmem:[#allocation4 + $0x4] ss:$16 sps:$4 sm:$0xff]   ;;  %v2667_v14 = vld [vmem:[#allocation4 + $0xc] ss:$16 sps:$4 sm:$0xff]  }
 0x350   :  { %1117 = vmatprep.subr.bf16.mxu0 %v2272_v15  ;;  %1158 = vmatprep.subr.bf16.mxu1 %v2275_v16  ;;  %v984_v15 = vunpack.c.l.bf16 %v2474_v20  ;;  %v2964_v16 = vld [vmem:[#allocation7_spill] sm:$0xff] }
 0x351   :  { %1147 = vmatprep.mubr.bf16.mxu0 %v2963_v56  ;;  %1188 = vmatprep.mubr.bf16.mxu1 %v2963_v56 }
 0x353   :  { %1118 = vmatpush1.bf16.msra.mxu0 %v2279_v17  ;;  %1159 = vmatpush1.bf16.msra.mxu1 %v2283_v18  ;;  %v986_v17 = vunpack.c.l.bf16 %v2964_v16 }
 0x354   :  { %1119 = vmatprep.subr.bf16.mxu0 %v2287_v19  ;;  %1160 = vmatprep.subr.bf16.mxu1 %v2294_v21  ;;  %v985_v21 = vunpack.c.h.bf16 %v2474_v20 }
 0x357   :  { %1120 = vmatpush1.bf16.msra.mxu0 %v2296_v22  ;;  %1161 = vmatpush1.bf16.msra.mxu1 %v2300_v23  ;;  %v987_v22 = vunpack.c.h.bf16 %v2964_v16  ;;  %v2718_v16 = vld [vmem:[#allocation4 + $0x6c] ss:$16 sps:$4 sm:$0xff]  }
 0x358   :  { %1121 = vmatprep.subr.bf16.mxu0 %v2304_v24  ;;  %1162 = vmatprep.subr.bf16.mxu1 %v2306_v25 }
 0x35b   :  { %1122 = vmatpush1.bf16.msra.mxu0 %v2310_v26  ;;  %1163 = vmatpush1.bf16.msra.mxu1 %v2314_v27 }
 0x35c   :  { %1123 = vmatprep.subr.bf16.mxu0 %v2318_v28  ;;  %1164 = vmatprep.subr.bf16.mxu1 %v2320_v29 }
 0x35f   :  { %1124 = vmatpush1.bf16.msra.mxu0 %v2327_v31  ;;  %1165 = vmatpush1.bf16.msra.mxu1 %v2329_v32 }
 0x360   :  { %1125 = vmatprep.subr.bf16.mxu0 %v2333_v33  ;;  %1166 = vmatprep.subr.bf16.mxu1 %v2337_v34 }
 0x363   :  { %1126 = vmatpush1.bf16.msra.mxu0 %v2341_v35  ;;  %1167 = vmatpush1.bf16.msra.mxu1 %v2343_v36 }
 0x364   :  { %1127 = vmatprep.subr.bf16.mxu0 %v2347_v37  ;;  %1168 = vmatprep.subr.bf16.mxu1 %v2351_v38 }
 0x367   :  { %1128 = vmatpush1.bf16.msra.mxu0 %v2366_v41  ;;  %1169 = vmatpush1.bf16.msra.mxu1 %v2368_v42 }
 0x368   :  { %1129 = vmatprep.subr.bf16.mxu0 %v2373_v44  ;;  %1170 = vmatprep.subr.bf16.mxu1 %v2375_v45 }
 0x36b   :  { %1130 = vmatpush1.bf16.msra.mxu0 %v2382_v46  ;;  %1171 = vmatpush1.bf16.msra.mxu1 %v2384_v47 }
 0x36c   :  { %1241 = vmatprep.subr.bf16.mxu0 %v2664_v13  ;;  %1282 = vmatprep.subr.bf16.mxu1 %v2667_v14 }
 0x421   :  { %v1023_v18 = vpop.f32.mrb[28].mxu0  ;;  %v1064_v19 = vpop.f32.mrb[28].mxu1 }
 0x422   :  { %v1071_v23 = vadd.f32 %v1023_v18, %v984_v15  ;;  %v1073_v24 = vadd.f32 %v1064_v19, %v986_v17  ;;  %v1025_v25 = vpop.f32.mrb[29].mxu0  ;;  %v1066_v26 = vpop.f32.mrb[29].mxu1  ;;  %v2715_v15 = vld [vmem:[#allocation4 + $0x64] ss:$16 sps:$4 sm:$0xff]   ;;  %v2721_v17 = vld [vmem:[#allocation4 + $0x60] ss:$16 sps:$4 sm:$0xff]  }
 0x423   :  { %v1072_v27 = vadd.f32 %v1025_v25, %v985_v21  ;;  %v1074_v28 = vadd.f32 %v1066_v26, %v987_v22  ;;  %v1027_v29 = vpop.f32.mrb[30].mxu0  ;;  %v1068_v31 = vpop.f32.mrb[30].mxu1  ;;  %v2724_v18 = vld [vmem:[#allocation4 + $0x68] ss:$16 sps:$4 sm:$0xff]   ;;  %v2727_v19 = vld [vmem:[#allocation4 + $0x84] ss:$16 sps:$4 sm:$0xff]  }
 0x424   :  { %v1800_v32 = vmul.f32 -1.442695, %v1071_v23  ;;  %v1028_v33 = vpop.f32.mrb[31].mxu0  ;;  %v1069_v34 = vpop.f32.mrb[31].mxu1  ;;  %v2730_v21 = vld [vmem:[#allocation4 + $0x8c] ss:$16 sps:$4 sm:$0xff]  }
 0x425   :  { %v1801_v58 = vmul.f32 -1.442695, %v1072_v27  ;;  %v1802_v1 = vmul.f32 -1.442695, %v1074_v28  ;;  %v2733_v22 = vld [vmem:[#allocation4 + $0x80] ss:$16 sps:$4 sm:$0xff]  }
 0x426   :  { %2030 = vpow2.f32 %v1800_v32  ;;  %v2736_v23 = vld [vmem:[#allocation4 + $0x88] ss:$16 sps:$4 sm:$0xff]   ;;  %v2742_v25 = vld [vmem:[#allocation4 + $0xac] ss:$16 sps:$4 sm:$0xff]  }
 0x427   :  { %2032 = vpow2.f32 %v1801_v58 }
 0x428   :  { %2034 = vpow2.f32 %v1802_v1 }
 0x429   :  { %2036 = vtanh.f32 %v1073_v24  ;;  %v2739_v24 = vld [vmem:[#allocation4 + $0xa4] ss:$16 sps:$4 sm:$0xff]  }
 0x430   :  { %v2031_v10 = vpop.eup %2030 }
 0x431   :  { %v2033_v57 = vpop.eup %2032  ;;  %v1078_v20 = vadd.f32 1.0, %v2031_v10 }
 0x432   :  { %v1084_v40 = vadd.f32 1.0, %v2033_v57  ;;  %v2035_v11 = vpop.eup %2034 }
 0x433   :  { %2038 = vrcp.f32 %v1078_v20  ;;  %v2037_v48 = vpop.eup %2036  ;;  %v1091_v54 = vadd.f32 1.0, %v2035_v11 }
 0x434   :  { %2040 = vrcp.f32 %v1084_v40 }
 0x435   :  { %2042 = vrcp.f32 %v1091_v54 }
 0x43d   :  { %v2039_v12 = vpop.eup %2038 }
 0x43e   :  { %v2041_v43 = vpop.eup %2040  ;;  %v1095_v30 = vmul.f32 %v2039_v12, %v2037_v48 }
 0x43f   :  { %v1094_v59 = vmul.f32 %v2041_v43, %v2625_v2  ;;  %v2043_v6 = vpop.eup %2042 }
 0x441   :  { %v1096_v7 = vadd.f32 %v1095_v30, %v1094_v59  ;;  %v1229_v30 = vpop.permute.xlu0 %1228 }
 0x442   :  { %vm1230_vm14 = vcmp.eq.s32.totalorder %v1229_v30, 1 }
 0x443   :  { %2044 = vtanh.f32 %v1096_v7  ;;  %v2676_v9 = vsel %vm1104_vm13, %v1096_v7, %v2625_v2  ;;  %v2697_v2 = vld [vmem:[#allocation4 + $0x20] ss:$16 sps:$4 sm:$0xff]  }
 0x44d   :  { %v2045_v39 = vpop.eup %2044 }
 0x44e   :  { %v1098_v52 = vmul.f32 %v2045_v39, %v2043_v6 }
 0x450   :  { %v2679_v49 = vsel %vm1104_vm13, %v1098_v52, %v2628_v51  ;;  %v2709_v51 = vld [vmem:[#allocation4 + $0x40] ss:$16 sps:$4 sm:$0xff]  }
 0x451   :  { %v1114_v63 = vpack.c.bf16 %v2679_v49, %v2679_v49 }
 0x453   :  { %1148 = vmatmul.mubr.bf16.vlgmr.msra.gmra.mrb[32].mxu0 %v1114_v63  ;;  %1189 = vmatmul.mubr.bf16.vlgmr.msra.gmra.mrb[32].mxu1 %v1114_v63  ;;  %v2798_v63 = vld [vmem:[#allocation4 + $0xc4] ss:$16 sps:$4 sm:$0xff]  }
 0x454   :  { %1242 = vmatpush1.bf16.msra.mxu0 %v2683_v55  ;;  %1283 = vmatpush1.bf16.msra.mxu1 %v2686_v60 }
 0x455   :  { %1243 = vmatprep.subr.bf16.mxu0 %v2689_v53  ;;  %1284 = vmatprep.subr.bf16.mxu1 %v2692_v61 }
 0x456   :  { %1273 = vmatprep.mubr.bf16.mxu0 %v2963_v56  ;;  %1314 = vmatprep.mubr.bf16.mxu1 %v2963_v56 }
 0x458   :  { %1244 = vmatpush1.bf16.msra.mxu0 %v2697_v2  ;;  %1285 = vmatpush1.bf16.msra.mxu1 %v2700_v0 }
 0x459   :  { %1245 = vmatprep.subr.bf16.mxu0 %v2703_v3  ;;  %1286 = vmatprep.subr.bf16.mxu1 %v2706_v50 }
 0x45c   :  { %1246 = vmatpush1.bf16.msra.mxu0 %v2709_v51  ;;  %1287 = vmatpush1.bf16.msra.mxu1 %v2712_v4 }
 0x45d   :  { %1247 = vmatprep.subr.bf16.mxu0 %v2715_v15  ;;  %1288 = vmatprep.subr.bf16.mxu1 %v2718_v16 }
 0x460   :  { %1248 = vmatpush1.bf16.msra.mxu0 %v2721_v17  ;;  %1289 = vmatpush1.bf16.msra.mxu1 %v2724_v18 }
 0x461   :  { %1249 = vmatprep.subr.bf16.mxu0 %v2727_v19  ;;  %1290 = vmatprep.subr.bf16.mxu1 %v2730_v21 }
 0x464   :  { %1250 = vmatpush1.bf16.msra.mxu0 %v2733_v22  ;;  %1291 = vmatpush1.bf16.msra.mxu1 %v2736_v23 }
 0x465   :  { %1251 = vmatprep.subr.bf16.mxu0 %v2739_v24  ;;  %1292 = vmatprep.subr.bf16.mxu1 %v2742_v25 }
 0x468   :  { %1252 = vmatpush1.bf16.msra.mxu0 %v2341_v35  ;;  %1293 = vmatpush1.bf16.msra.mxu1 %v2343_v36  ;;  %v1110_v35 = vunpack.c.l.bf16 %v2484_v5  ;;  %v1112_v36 = vunpack.c.l.bf16 %v2487_v8 }
 0x469   :  { %1253 = vmatprep.subr.bf16.mxu0 %v2347_v37  ;;  %1294 = vmatprep.subr.bf16.mxu1 %v2351_v38 }
 0x46c   :  { %1254 = vmatpush1.bf16.msra.mxu0 %v2366_v41  ;;  %1295 = vmatpush1.bf16.msra.mxu1 %v2368_v42  ;;  %v1111_v41 = vunpack.c.h.bf16 %v2484_v5  ;;  %v1113_v42 = vunpack.c.h.bf16 %v2487_v8 }
 0x46d   :  { %1255 = vmatprep.subr.bf16.mxu0 %v2373_v44  ;;  %1296 = vmatprep.subr.bf16.mxu1 %v2375_v45 }
 0x470   :  { %1256 = vmatpush1.bf16.msra.mxu0 %v2382_v46  ;;  %1297 = vmatpush1.bf16.msra.mxu1 %v2384_v47 }
 0x471   :  { %1367 = vmatprep.subr.bf16.mxu0 %v2664_v13  ;;  %1408 = vmatprep.subr.bf16.mxu1 %v2667_v14 }
 0x526   :  { %v1149_v37 = vpop.f32.mrb[32].mxu0  ;;  %v1190_v38 = vpop.f32.mrb[32].mxu1 }
 0x527   :  { %v1197_v44 = vadd.f32 %v1149_v37, %v1110_v35  ;;  %v1199_v45 = vadd.f32 %v1190_v38, %v1112_v36  ;;  %v1151_v26 = vpop.f32.mrb[33].mxu0  ;;  %v1192_v46 = vpop.f32.mrb[33].mxu1  ;;  %v2801_v35 = vld [vmem:[#allocation4 + $0xcc] ss:$16 sps:$4 sm:$0xff]   ;;  %v2804_v36 = vld [vmem:[#allocation4 + $0xc0] ss:$16 sps:$4 sm:$0xff]  }
 0x528   :  { %v1198_v27 = vadd.f32 %v1151_v26, %v1111_v41  ;;  %v1200_v47 = vadd.f32 %v1192_v46, %v1113_v42  ;;  %v1153_v28 = vpop.f32.mrb[34].mxu0  ;;  %v1194_v29 = vpop.f32.mrb[34].mxu1  ;;  %v2807_v37 = vld [vmem:[#allocation4 + $0xc8] ss:$16 sps:$4 sm:$0xff]   ;;  %v2810_v38 = vld [vmem:[#allocation4 + $0xe4] ss:$16 sps:$4 sm:$0xff]  }
 0x529   :  { %v1803_v31 = vmul.f32 -1.442695, %v1197_v44  ;;  %v1154_v32 = vpop.f32.mrb[35].mxu0  ;;  %v1195_v33 = vpop.f32.mrb[35].mxu1  ;;  %v2813_v41 = vld [vmem:[#allocation4 + $0xec] ss:$16 sps:$4 sm:$0xff]  }
 0x52a   :  { %v1804_v34 = vmul.f32 -1.442695, %v1198_v27  ;;  %v1805_v58 = vmul.f32 -1.442695, %v1200_v47  ;;  %v2816_v42 = vld [vmem:[#allocation4 + $0xe0] ss:$16 sps:$4 sm:$0xff]  }
 0x52b   :  { %2046 = vpow2.f32 %v1803_v31  ;;  %v2819_v44 = vld [vmem:[#allocation4 + $0xe8] ss:$16 sps:$4 sm:$0xff]   ;;  %v2966_v46 = vld [vmem:[#allocation9_spill] sm:$0xff] }
 0x52c   :  { %2048 = vpow2.f32 %v1804_v34  ;;  %v1238_v27 = vunpack.c.l.bf16 %v2966_v46  ;;  %v1239_v31 = vunpack.c.h.bf16 %v2966_v46 }
 0x52d   :  { %2050 = vpow2.f32 %v1805_v58 }
 0x52e   :  { %2052 = vtanh.f32 %v1199_v45  ;;  %v2965_v45 = vld [vmem:[#allocation8_spill] sm:$0xff] }
 0x52f   :  { %v1236_v26 = vunpack.c.l.bf16 %v2965_v45  ;;  %v1237_v29 = vunpack.c.h.bf16 %v2965_v45 }
 0x535   :  { %v2047_v1 = vpop.eup %2046 }
 0x536   :  { %v2049_v10 = vpop.eup %2048  ;;  %v1204_v5 = vadd.f32 1.0, %v2047_v1 }
 0x537   :  { %v1210_v8 = vadd.f32 1.0, %v2049_v10  ;;  %v2051_v57 = vpop.eup %2050 }
 0x538   :  { %2054 = vrcp.f32 %v1204_v5  ;;  %v2053_v20 = vpop.eup %2052  ;;  %v1217_v12 = vadd.f32 1.0, %v2051_v57 }
 0x539   :  { %2056 = vrcp.f32 %v1210_v8 }
 0x53a   :  { %2058 = vrcp.f32 %v1217_v12 }
 0x542   :  { %v2055_v40 = vpop.eup %2054 }
 0x543   :  { %v2057_v11 = vpop.eup %2056  ;;  %v1221_v48 = vmul.f32 %v2055_v40, %v2053_v20 }
 0x544   :  { %v1220_v43 = vmul.f32 %v2057_v11, %v2676_v9  ;;  %v2059_v62 = vpop.eup %2058 }
 0x546   :  { %v1222_v54 = vadd.f32 %v1221_v48, %v1220_v43 }
 0x548   :  { %2060 = vtanh.f32 %v1222_v54  ;;  %v2763_v59 = vsel %vm1230_vm14, %v1222_v54, %v2676_v9  ;;  %v2792_v9 = vld [vmem:[#allocation4 + $0xa0] ss:$16 sps:$4 sm:$0xff]  }
 0x552   :  { %v2061_v7 = vpop.eup %2060 }
 0x553   :  { %v1224_v6 = vmul.f32 %v2061_v7, %v2059_v62 }
 0x555   :  { %v2766_v39 = vsel %vm1230_vm14, %v1224_v6, %v2679_v49  ;;  %v2795_v49 = vld [vmem:[#allocation4 + $0xa8] ss:$16 sps:$4 sm:$0xff]  }
 0x556   :  { %v1240_v52 = vpack.c.bf16 %v2766_v39, %v2766_v39 }
 0x558   :  { %1274 = vmatmul.mubr.bf16.vlgmr.msra.gmra.mrb[36].mxu0 %v1240_v52  ;;  %1315 = vmatmul.mubr.bf16.vlgmr.msra.gmra.mrb[36].mxu1 %v1240_v52 }
 0x559   :  { %1368 = vmatpush1.bf16.msra.mxu0 %v2683_v55  ;;  %1409 = vmatpush1.bf16.msra.mxu1 %v2686_v60 }
 0x55a   :  { %1369 = vmatprep.subr.bf16.mxu0 %v2689_v53  ;;  %1410 = vmatprep.subr.bf16.mxu1 %v2692_v61 }
 0x55b   :  { %1399 = vmatprep.mubr.bf16.mxu0 %v2963_v56  ;;  %1440 = vmatprep.mubr.bf16.mxu1 %v2963_v56 }
 0x55d   :  { %1370 = vmatpush1.bf16.msra.mxu0 %v2697_v2  ;;  %1411 = vmatpush1.bf16.msra.mxu1 %v2700_v0 }
 0x55e   :  { %1371 = vmatprep.subr.bf16.mxu0 %v2703_v3  ;;  %1412 = vmatprep.subr.bf16.mxu1 %v2706_v50 }
 0x561   :  { %1372 = vmatpush1.bf16.msra.mxu0 %v2709_v51  ;;  %1413 = vmatpush1.bf16.msra.mxu1 %v2712_v4 }
 0x562   :  { %1373 = vmatprep.subr.bf16.mxu0 %v2715_v15  ;;  %1414 = vmatprep.subr.bf16.mxu1 %v2718_v16 }
 0x565   :  { %1374 = vmatpush1.bf16.msra.mxu0 %v2721_v17  ;;  %1415 = vmatpush1.bf16.msra.mxu1 %v2724_v18 }
 0x566   :  { %1375 = vmatprep.subr.bf16.mxu0 %v2727_v19  ;;  %1416 = vmatprep.subr.bf16.mxu1 %v2730_v21 }
 0x569   :  { %1376 = vmatpush1.bf16.msra.mxu0 %v2733_v22  ;;  %1417 = vmatpush1.bf16.msra.mxu1 %v2736_v23 }
 0x56a   :  { %1377 = vmatprep.subr.bf16.mxu0 %v2739_v24  ;;  %1418 = vmatprep.subr.bf16.mxu1 %v2742_v25 }
 0x56d   :  { %1378 = vmatpush1.bf16.msra.mxu0 %v2792_v9  ;;  %1419 = vmatpush1.bf16.msra.mxu1 %v2795_v49 }
 0x56e   :  { %1379 = vmatprep.subr.bf16.mxu0 %v2798_v63  ;;  %1420 = vmatprep.subr.bf16.mxu1 %v2801_v35 }
 0x571   :  { %1380 = vmatpush1.bf16.msra.mxu0 %v2804_v36  ;;  %1421 = vmatpush1.bf16.msra.mxu1 %v2807_v37 }
 0x572   :  { %1381 = vmatprep.subr.bf16.mxu0 %v2810_v38  ;;  %1422 = vmatprep.subr.bf16.mxu1 %v2813_v41 }
 0x575   :  { %1382 = vmatpush1.bf16.msra.mxu0 %v2816_v42  ;;  %1423 = vmatpush1.bf16.msra.mxu1 %v2819_v44 }
 0x576   :  { %1493 = vmatprep.subr.bf16.mxu0 %v2664_v13  ;;  %1534 = vmatprep.subr.bf16.mxu1 %v2667_v14 }
 0x62b   :  { %v1275_v47 = vpop.f32.mrb[36].mxu0  ;;  %v1316_v28 = vpop.f32.mrb[36].mxu1 }
 0x62c   :  { %v1323_v32 = vadd.f32 %v1275_v47, %v1236_v26  ;;  %v1325_v33 = vadd.f32 %v1316_v28, %v1238_v27  ;;  %v1277_v34 = vpop.f32.mrb[37].mxu0  ;;  %v1318_v58 = vpop.f32.mrb[37].mxu1 }
 0x62d   :  { %v1324_v1 = vadd.f32 %v1277_v34, %v1237_v29  ;;  %v1326_v10 = vadd.f32 %v1318_v58, %v1239_v31  ;;  %v1279_v5 = vpop.f32.mrb[38].mxu0  ;;  %v1320_v13 = vpop.f32.mrb[38].mxu1 }
 0x62e   :  { %v1806_v8 = vmul.f32 -1.442695, %v1323_v32  ;;  %v1280_v14 = vpop.f32.mrb[39].mxu0  ;;  %v1321_v57 = vpop.f32.mrb[39].mxu1 }
 0x62f   :  { %v1807_v20 = vmul.f32 -1.442695, %v1324_v1  ;;  %v1808_v40 = vmul.f32 -1.442695, %v1326_v10  ;;  %v1355_v26 = vpop.permute.xlu1 %1354  ;;  %v1611_v14 = vld [vmem:[%s2944_s5 + $0x8] sm:$0xff] }
 0x630   :  { %2062 = vpow2.f32 %v1806_v8  ;;  %vm1356_vm15 = vcmp.eq.s32.totalorder %v1355_v26, 1  ;;  %v1610_v8 = vld [vmem:[%s2944_s5] sm:$0xff]  ;;  %v1620_v26 = vld [vmem:[%s2944_s5 + $0x50] sm:$0xff] }
 0x631   :  { %2064 = vpow2.f32 %v1807_v20  ;;  %v1886_v57 = vpack.c.bf16 %v1611_v14, %v1610_v8  ;;  %v2174_v20 = vmov 0.0|0.0  }
 0x632   :  { %2066 = vpow2.f32 %v1808_v40  ;;  %v1612_v40 = vld [vmem:[%s2944_s5 + $0x10] sm:$0xff] }
 0x633   :  { %2068 = vtanh.f32 %v1325_v33 }
 0x63a   :  { %v2063_v11 = vpop.eup %2062 }
 0x63b   :  { %v2065_v48 = vpop.eup %2064  ;;  %v1330_v12 = vadd.f32 1.0, %v2063_v11  ;;  %v1613_v11 = vld [vmem:[%s2944_s5 + $0x18] sm:$0xff] }
 0x63c   :  { %v1336_v43 = vadd.f32 1.0, %v2065_v48  ;;  %v2067_v30 = vpop.eup %2066  ;;  %v1889_v48 = vpack.c.bf16 %v1613_v11, %v1612_v40 }
 0x63d   :  { %2070 = vrcp.f32 %v1330_v12  ;;  %v2069_v54 = vpop.eup %2068  ;;  %v1343_v52 = vadd.f32 1.0, %v2067_v30  ;;  %v1614_v12 = vld [vmem:[%s2944_s5 + $0x20] sm:$0xff] }
 0x63e   :  { %2072 = vrcp.f32 %v1336_v43  ;;  %v1615_v43 = vld [vmem:[%s2944_s5 + $0x28] sm:$0xff] }
 0x63f   :  { %2074 = vrcp.f32 %v1343_v52  ;;  %v1892_v30 = vpack.c.bf16 %v1615_v43, %v1614_v12  ;;  %v1619_v52 = vld [vmem:[%s2944_s5 + $0x48] sm:$0xff] }
 0x647   :  { %v2071_v62 = vpop.eup %2070 }
 0x648   :  { %v2073_v7 = vpop.eup %2072  ;;  %v1347_v6 = vmul.f32 %v2071_v62, %v2069_v54  ;;  %v1616_v54 = vld [vmem:[%s2944_s5 + $0x30] sm:$0xff]  ;;  %v1617_v62 = vld [vmem:[%s2944_s5 + $0x38] sm:$0xff] }
 0x649   :  { %v1346_v45 = vmul.f32 %v2073_v7, %v2763_v59  ;;  %v2075_v47 = vpop.eup %2074  ;;  %v1895_v7 = vpack.c.bf16 %v1617_v62, %v1616_v54 }
 0x64b   :  { %v1348_v46 = vadd.f32 %v1347_v6, %v1346_v45  ;;  %v1618_v6 = vld [vmem:[%s2944_s5 + $0x40] sm:$0xff] }
 0x64c   :  { %v1898_v45 = vpack.c.bf16 %v1619_v52, %v1618_v6 }
 0x64d   :  { %2076 = vtanh.f32 %v1348_v46  ;;  %v2830_v27 = vsel %vm1356_vm15, %v1348_v46, %v2763_v59  ;;  %v1621_v46 = vld [vmem:[%s2944_s5 + $0x58] sm:$0xff] }
 0x657   :  { %v2077_v28 = vpop.eup %2076 }
 0x658   :  { %v1350_v29 = vmul.f32 %v2077_v28, %v2075_v47  ;;  %v1622_v47 = vld [vmem:[%s2944_s5 + $0x60] sm:$0xff]  ;;  %v1623_v28 = vld [vmem:[%s2944_s5 + $0x68] sm:$0xff] }
 0x65a   :  { %v2833_v31 = vsel %vm1356_vm15, %v1350_v29, %v2766_v39  ;;  %v2176_v29 = vmov 0.0  }
 0x65b   :  { %v1366_v32 = vpack.c.bf16 %v2833_v31, %v2833_v31 }
 0x65d   :  { %1400 = vmatmul.mubr.bf16.vlgmr.msra.gmra.mrb[40].mxu0 %v1366_v32  ;;  %1441 = vmatmul.mubr.bf16.vlgmr.msra.gmra.mrb[40].mxu1 %v1366_v32  ;;  %v1624_v32 = vld [vmem:[%s2944_s5 + $0x70] sm:$0xff] }
 0x65e   :  { %1494 = vmatpush1.bf16.msra.mxu0 %v2683_v55  ;;  %1535 = vmatpush1.bf16.msra.mxu1 %v2686_v60  ;;  %v2968_v60 = vld [vmem:[#allocation11_spill] sm:$0xff] }
 0x65f   :  { %1495 = vmatprep.subr.bf16.mxu0 %v2689_v53  ;;  %1536 = vmatprep.subr.bf16.mxu1 %v2692_v61  ;;  %v1364_v53 = vunpack.c.l.bf16 %v2968_v60 }
 0x660   :  { %1525 = vmatprep.mubr.bf16.mxu0 %v2963_v56  ;;  %1566 = vmatprep.mubr.bf16.mxu1 %v2963_v56  ;;  %v2967_v56 = vld [vmem:[#allocation10_spill] sm:$0xff] }
 0x661   :  { %v1362_v55 = vunpack.c.l.bf16 %v2967_v56 }
 0x662   :  { %1496 = vmatpush1.bf16.msra.mxu0 %v2697_v2  ;;  %1537 = vmatpush1.bf16.msra.mxu1 %v2700_v0  ;;  %v1363_v0 = vunpack.c.h.bf16 %v2967_v56  ;;  %v1625_v56 = vld [vmem:[%s2944_s5 + $0x78] sm:$0xff] }
 0x663   :  { %1497 = vmatprep.subr.bf16.mxu0 %v2703_v3  ;;  %1538 = vmatprep.subr.bf16.mxu1 %v2706_v50  ;;  %v1365_v3 = vunpack.c.h.bf16 %v2968_v60  ;;  %v2969_v60 = vld [vmem:[#allocation12_spill] sm:$0xff] }
 0x666   :  { %1498 = vmatpush1.bf16.msra.mxu0 %v2709_v51  ;;  %1539 = vmatpush1.bf16.msra.mxu1 %v2712_v4 }
 0x667   :  { %1499 = vmatprep.subr.bf16.mxu0 %v2715_v15  ;;  %1540 = vmatprep.subr.bf16.mxu1 %v2718_v16 }
 0x66a   :  { %1500 = vmatpush1.bf16.msra.mxu0 %v2721_v17  ;;  %1541 = vmatpush1.bf16.msra.mxu1 %v2724_v18 }
 0x66b   :  { %1501 = vmatprep.subr.bf16.mxu0 %v2727_v19  ;;  %1542 = vmatprep.subr.bf16.mxu1 %v2730_v21 }
 0x66e   :  { %1502 = vmatpush1.bf16.msra.mxu0 %v2733_v22  ;;  %1543 = vmatpush1.bf16.msra.mxu1 %v2736_v23 }
 0x66f   :  { %1503 = vmatprep.subr.bf16.mxu0 %v2739_v24  ;;  %1544 = vmatprep.subr.bf16.mxu1 %v2742_v25 }
 0x672   :  { %1504 = vmatpush1.bf16.msra.mxu0 %v2792_v9  ;;  %1545 = vmatpush1.bf16.msra.mxu1 %v2795_v49 }
 0x673   :  { %1505 = vmatprep.subr.bf16.mxu0 %v2798_v63  ;;  %1546 = vmatprep.subr.bf16.mxu1 %v2801_v35 }
 0x676   :  { %1506 = vmatpush1.bf16.msra.mxu0 %v2804_v36  ;;  %1547 = vmatpush1.bf16.msra.mxu1 %v2807_v37 }
 0x677   :  { %1507 = vmatprep.subr.bf16.mxu0 %v2810_v38  ;;  %1548 = vmatprep.subr.bf16.mxu1 %v2813_v41 }
 0x67a   :  { %1508 = vmatpush1.bf16.msra.mxu0 %v2816_v42  ;;  %1549 = vmatpush1.bf16.msra.mxu1 %v2819_v44  ;;  %v1481_v42 = vpop.permute.xlu0 %1480 }
 0x67b   :  { %vm1482_vm0 = vcmp.eq.s32.totalorder %v1481_v42, 1  ;;  %1885 = vmatprep.subr.bf16.mxu0 %v2174_v20 }
 0x730   :  { %v1401_v61 = vpop.f32.mrb[40].mxu0  ;;  %v1442_v2 = vpop.f32.mrb[40].mxu1 }
 0x731   :  { %v1449_v50 = vadd.f32 %v1401_v61, %v1362_v55  ;;  %v1451_v51 = vadd.f32 %v1442_v2, %v1364_v53  ;;  %v1403_v4 = vpop.f32.mrb[41].mxu0  ;;  %v1444_v15 = vpop.f32.mrb[41].mxu1  ;;  %v1907_v55 = vpack.c.bf16 %v1625_v56, %v1624_v32  ;;  %v1488_v53 = vunpack.c.l.bf16 %v2969_v60  ;;  %v2970_v61 = vld [vmem:[#allocation13_spill] sm:$0xff] }
 0x732   :  { %v1450_v16 = vadd.f32 %v1403_v4, %v1363_v0  ;;  %v1452_v17 = vadd.f32 %v1444_v15, %v1365_v3  ;;  %v1405_v18 = vpop.f32.mrb[42].mxu0  ;;  %v1446_v19 = vpop.f32.mrb[42].mxu1  ;;  %v1490_v2 = vunpack.c.l.bf16 %v2970_v61 }
 0x733   :  { %v1809_v21 = vmul.f32 -1.442695, %v1449_v50  ;;  %v1406_v22 = vpop.f32.mrb[43].mxu0  ;;  %v1447_v23 = vpop.f32.mrb[43].mxu1  ;;  %v1489_v50 = vunpack.c.h.bf16 %v2969_v60 }
 0x734   :  { %v1810_v24 = vmul.f32 -1.442695, %v1450_v16  ;;  %v1811_v25 = vmul.f32 -1.442695, %v1452_v17 }
 0x735   :  { %2078 = vpow2.f32 %v1809_v21 }
 0x736   :  { %2080 = vpow2.f32 %v1810_v24 }
 0x737   :  { %2082 = vpow2.f32 %v1811_v25 }
 0x738   :  { %2084 = vtanh.f32 %v1451_v51  ;;  %v1491_v51 = vunpack.c.h.bf16 %v2970_v61 }
 0x73f   :  { %v2079_v59 = vpop.eup %2078 }
 0x740   :  { %v2081_v39 = vpop.eup %2080  ;;  %v1456_v9 = vadd.f32 1.0, %v2079_v59 }
 0x741   :  { %v1462_v49 = vadd.f32 1.0, %v2081_v39  ;;  %v2083_v63 = vpop.eup %2082 }
 0x742   :  { %2086 = vrcp.f32 %v1456_v9  ;;  %v2085_v35 = vpop.eup %2084  ;;  %v1469_v41 = vadd.f32 1.0, %v2083_v63 }
 0x743   :  { %2088 = vrcp.f32 %v1462_v49 }
 0x744   :  { %2090 = vrcp.f32 %v1469_v41 }
 0x74c   :  { %v2087_v36 = vpop.eup %2086 }
 0x74d   :  { %v2089_v37 = vpop.eup %2088  ;;  %v1473_v38 = vmul.f32 %v2087_v36, %v2085_v35 }
 0x74e   :  { %v1472_v44 = vmul.f32 %v2089_v37, %v2830_v27  ;;  %v2091_v58 = vpop.eup %2090 }
 0x750   :  { %v1474_v33 = vadd.f32 %v1473_v38, %v1472_v44 }
 0x752   :  { %2092 = vtanh.f32 %v1474_v33  ;;  %v2875_v34 = vsel %vm1482_vm0, %v1474_v33, %v2830_v27  ;;  %v1901_v27 = vpack.c.bf16 %v1621_v46, %v1620_v26 }
 0x75c   :  { %v2093_v1 = vpop.eup %2092 }
 0x75d   :  { %v1476_v10 = vmul.f32 %v2093_v1, %v2091_v58 }
 0x75f   :  { %v2878_v5 = vsel %vm1482_vm0, %v1476_v10, %v2833_v31  ;;  %v1904_v31 = vpack.c.bf16 %v1623_v28, %v1622_v47  ;;  %v1607_v10 = vpop.permute.xlu1 %1606 }
 0x760   :  { %v1492_v13 = vpack.c.bf16 %v2878_v5, %v2878_v5  ;;  %vm1608_vm2 = vcmp.eq.s32.totalorder %v1607_v10, 1 }
 0x762   :  { %1526 = vmatmul.mubr.bf16.vlgmr.msra.gmra.mrb[44].mxu0 %v1492_v13  ;;  %1567 = vmatmul.mubr.bf16.vlgmr.msra.gmra.mrb[44].mxu1 %v1492_v13 }
 0x763   :  { %1887 = vmatpush3.bf16.msra.mxu0 %v1886_v57  ;;  %1882 = vmatprep.mubr.msk.f32.mxu0 %vm2175_vm1, %v2176_v29  ;;  %v1815_v57 = vld [vmem:[#allocation3] ss:$0 sm:$0xff] }
 0x764   :  { %1888 = vmatprep.subr.bf16.mxu0 %v2174_v20 }
 0x767   :  { %1890 = vmatpush3.bf16.msra.mxu0 %v1889_v48 }
 0x768   :  { %1891 = vmatprep.subr.bf16.mxu0 %v2174_v20 }
 0x76b   :  { %1893 = vmatpush3.bf16.msra.mxu0 %v1892_v30 }
 0x76c   :  { %1894 = vmatprep.subr.bf16.mxu0 %v2174_v20 }
 0x76f   :  { %1896 = vmatpush3.bf16.msra.mxu0 %v1895_v7 }
 0x770   :  { %1897 = vmatprep.subr.bf16.mxu0 %v2174_v20 }
 0x773   :  { %1899 = vmatpush3.bf16.msra.mxu0 %v1898_v45 }
 0x774   :  { %1900 = vmatprep.subr.bf16.mxu0 %v2174_v20 }
 0x777   :  { %1902 = vmatpush3.bf16.msra.mxu0 %v1901_v27 }
 0x778   :  { %1903 = vmatprep.subr.bf16.mxu0 %v2174_v20 }
 0x77b   :  { %1905 = vmatpush3.bf16.msra.mxu0 %v1904_v31 }
 0x77c   :  { %1906 = vmatprep.subr.bf16.mxu0 %v2174_v20 }
 0x77f   :  { %1908 = vmatpush3.bf16.msra.mxu0 %v1907_v55 }
 0x835   :  { %v1527_v0 = vpop.f32.mrb[44].mxu0  ;;  %v1568_v3 = vpop.f32.mrb[44].mxu1 }
 0x836   :  { %v1575_v4 = vadd.f32 %v1527_v0, %v1488_v53  ;;  %v1577_v15 = vadd.f32 %v1568_v3, %v1490_v2  ;;  %v1529_v16 = vpop.f32.mrb[45].mxu0  ;;  %v1570_v17 = vpop.f32.mrb[45].mxu1 }
 0x837   :  { %v1576_v18 = vadd.f32 %v1529_v16, %v1489_v50  ;;  %v1578_v19 = vadd.f32 %v1570_v17, %v1491_v51  ;;  %v1531_v21 = vpop.f32.mrb[46].mxu0  ;;  %v1572_v22 = vpop.f32.mrb[46].mxu1 }
 0x838   :  { %v1812_v23 = vmul.f32 -1.442695, %v1575_v4  ;;  %v1532_v24 = vpop.f32.mrb[47].mxu0  ;;  %v1573_v25 = vpop.f32.mrb[47].mxu1 }
 0x839   :  { %v1813_v59 = vmul.f32 -1.442695, %v1576_v18  ;;  %v1814_v39 = vmul.f32 -1.442695, %v1578_v19 }
 0x83a   :  { %2094 = vpow2.f32 %v1812_v23 }
 0x83b   :  { %2096 = vpow2.f32 %v1813_v59 }
 0x83c   :  { %2098 = vpow2.f32 %v1814_v39 }
 0x83d   :  { %2100 = vtanh.f32 %v1577_v15 }
 0x844   :  { %v2095_v9 = vpop.eup %2094 }
 0x845   :  { %v2097_v49 = vpop.eup %2096  ;;  %v1582_v63 = vadd.f32 1.0, %v2095_v9 }
 0x846   :  { %v1588_v35 = vadd.f32 1.0, %v2097_v49  ;;  %v2099_v36 = vpop.eup %2098 }
 0x847   :  { %2102 = vrcp.f32 %v1582_v63  ;;  %v2101_v37 = vpop.eup %2100  ;;  %v1595_v44 = vadd.f32 1.0, %v2099_v36 }
 0x848   :  { %2104 = vrcp.f32 %v1588_v35 }
 0x849   :  { %2106 = vrcp.f32 %v1595_v44 }
 0x851   :  { %v2103_v38 = vpop.eup %2102 }
 0x852   :  { %v2105_v41 = vpop.eup %2104  ;;  %v1599_v42 = vmul.f32 %v2103_v38, %v2101_v37 }
 0x853   :  { %v1598_v33 = vmul.f32 %v2105_v41, %v2875_v34  ;;  %v2107_v1 = vpop.eup %2106 }
 0x855   :  { %v1600_v58 = vadd.f32 %v1599_v42, %v1598_v33 }
 0x857   :  { %2108 = vtanh.f32 %v1600_v58 }
 0x861   :  { %v2109_v13 = vpop.eup %2108 }
 0x862   :  { %v1602_v8 = vmul.f32 %v2109_v13, %v2107_v1 }
 0x864   :  { %v1609_v14 = vsel %vm1608_vm2, %v1602_v8, %v2878_v5 }
 0x865   :  { %1883 = vmatmul.mubr.f32.vlgmr.msra.gmra.mrb[48].mxu0 %v1609_v14 }
 0x938   :  { %v1699_v20 = vpop.f32.mrb[48].mxu0 }
 0x939   :  { %v1700_v40 = vadd.f32 %v1815_v57, %v1699_v20  ;;  %v1884_v11 = vpop.f32.mrb[49].mxu0 }
 0x93b   :  { %v1816_v48 = vmul.f32 -0.2, %v1700_v40 }
 0x93d   :  { %v1705_v12 = vmul.f32 1.442695, %v1816_v48 }
 0x93f   :  { %2110 = vpow2.f32 %v1705_v12 }
 0x949   :  { %v2111_v43 = vpop.eup %2110 }
 0x94a   :  { %v1707_v34 = vadd.f32 1.0, %v2111_v43 }
 0x94c   :  { %2112 = vrcp.f32 %v1707_v34 }
 0x956   :  { %v2113_v30 = vpop.eup %2112 }
 0x957   :  { %1711 = vst.msk [vmem:[%s2946_s7] sm:$0xff] %vm1710_vm3, %v2113_v30 }
 0x958   :  { %1716 = vsyncpa [#allocation5], 1 }

</bundles_post_ra>
